<compile_context>
chip_gen: v6e
topology: v6e:2x2x1
jax: 0.10.0
libtpu: 0.0.40
codegen_flags: <defaults>
</compile_context>

<pallas_src>
import functools

import jax
import jax.numpy as jnp
from jax import lax
from jax.experimental import pallas as pl
from jax.experimental.pallas import tpu as pltpu
import numpy as np


# ------------------------------ fused kernel -------------------------------- #

def fused_mbconv_kernel(H, W, Cin, hidden, Cout,
                        x_ref, wexp_ref, b1_ref,
                        wd_ref, b2_ref,
                        w1t_ref, bse1_ref, w2_ref, bse2_ref,
                        wp_ref, b3_ref,
                        o_ref,
                        xpad_ref, hbuf_ref):
    """One grid step = one image; activations stay lane-dense (rows, W*C) in VMEM.

    x_ref:   (1, H, W*Cin) f32          wexp_ref: (3, W*Cin, W*hidden) bf16 (BN1 scale folded)
    b1_ref:  (1, W*hidden) f32          wd_ref:   (9, W*hidden) f32 (BN2 scale folded, lane-tiled)
    b2_ref:  (1, W*hidden) f32
    w1t_ref: (R, hidden)   bse1_ref: (R, 1)
    w2_ref:  (R, hidden)   bse2_ref: (1, hidden)
    wp_ref:  (W*hidden, W*Cout) bf16 block-diagonal (BN3 scale folded)
    b3_ref:  (1, W*Cout)   o_ref: (1, H, W*Cout) f32
    scratch: xpad (H+2, W*Cin) f32 row-padded input
             hbuf (3*(H+2), W*hidden) f32 row-padded, x-shifted activations (kw = 0,1,2)
    """
    WC = W * Cin
    WH = W * hidden
    WO = W * Cout
    HP = H + 2

    x = x_ref[0]                                              # (H, W*Cin), lane-dense

    # ---------- expand: 3x3 conv -> BN -> SiLU (3 banded row-matmuls) ----------
    # Column padding is baked into the banded weights (pad taps are simply absent);
    # only 2 halo rows need zeroing.  Interior store is lane-aligned / unmasked.
    zrow_x = jnp.zeros((1, WC), jnp.float32)
    xpad_ref[0:1, :] = zrow_x
    xpad_ref[H + 1:H + 2, :] = zrow_x
    xpad_ref[1:H + 1, :] = x

    acc = jnp.zeros((H, WH), jnp.float32)
    for kh in range(3):
        lhs = xpad_ref[kh:kh + H, :].astype(jnp.bfloat16)     # (H, W*Cin), sublane offset only
        acc = acc + jnp.dot(lhs, wexp_ref[kh],
                            preferred_element_type=jnp.float32)
    h = acc + b1_ref[...]                                     # BN1 (scale folded into weights)
    h = h * jax.nn.sigmoid(h)                                 # SiLU, f32, (H, W*hidden)

    # ---------- depthwise 3x3 -> BN -> SiLU (lane-dense VPU FMAs) ----------
    # Build the two x-shifted copies once (2 lane relayouts total), store all three
    # kw-variants row-padded and lane-aligned, then 9 aligned loads + FMAs.
    zcol = jnp.zeros((H, hidden), jnp.float32)
    r_left = jnp.concatenate([zcol, h[:, :WH - hidden]], axis=1)   # source column x-1
    r_right = jnp.concatenate([h[:, hidden:], zcol], axis=1)       # source column x+1

    zrow_h = jnp.zeros((1, WH), jnp.float32)
    for kw, r in enumerate((r_left, h, r_right)):
        base = kw * HP
        hbuf_ref[base:base + 1, :] = zrow_h                    # top halo row
        hbuf_ref[base + H + 1:base + H + 2, :] = zrow_h        # bottom halo row
        hbuf_ref[base + 1:base + H + 1, :] = r                 # lane-aligned interior

    wd = wd_ref[...]                                           # (9, W*hidden), s2 folded
    acc2 = jnp.zeros((H, WH), jnp.float32)
    for kh in range(3):
        for kw in range(3):
            tap = kh * 3 + kw
            patch = hbuf_ref[kw * HP + kh: kw * HP + kh + H, :]    # aligned lanes
            acc2 = acc2 + patch * wd[tap:tap + 1, :]
    h2 = acc2 + b2_ref[...]                                    # BN2 (scale folded)
    h2 = h2 * jax.nn.sigmoid(h2)                               # SiLU, (H, W*hidden)

    # ---------- SqueezeExcitation (sublane reduce + lane-fold; no MXU) ----------
    colsum = jnp.sum(h2, axis=0, keepdims=True)                # (1, W*hidden)
    width = WH
    while width > hidden:                                      # fold W lane-groups together
        width //= 2
        colsum = colsum[:, :width] + colsum[:, width:2 * width]
    pooled = colsum * (1.0 / float(H * W))                                       # (1, hidden)
    s = jnp.sum(w1t_ref[...] * pooled, axis=1, keepdims=True) + bse1_ref[...]    # (R, 1)
    s = s * jax.nn.sigmoid(s)                                                    # SiLU
    g = jnp.sum(w2_ref[...] * s, axis=0, keepdims=True) + bse2_ref[...]          # (1, hidden)
    g = jax.nn.sigmoid(g)
    g_t = jnp.concatenate([g] * W, axis=1)                                       # (1, W*hidden)
    h3 = h2 * g_t                                                                # SE gate, lane-dense

    # ---------- 1x1 projection -> BN -> residual (single lane-dense matmul) ----------
    proj = jnp.dot(h3.astype(jnp.bfloat16), wp_ref[...],
                   preferred_element_type=jnp.float32)         # (H, W*Cout)
    out = proj + b3_ref[...] + x                               # BN3 bias + residual (Cin == Cout)
    o_ref[...] = out.reshape(1, H, WO)


# --------------------------------- wrapper ----------------------------------- #

def _rep(shape):
    nd = len(shape)
    return pl.BlockSpec(shape, lambda n, _nd=nd: (0,) * _nd)


def fold_bn(gamma, beta, mean, var, eps=1e-5):
    scale = gamma / jnp.sqrt(var + eps)
    bias = beta - mean * scale
    return scale, bias


def inverted_residual_forward(x_nchw, p):
    """Pallas implementation of InvertedResidualBlock.forward (eval mode)."""
    x = jnp.transpose(x_nchw, (0, 2, 3, 1)).astype(jnp.float32)   # NCHW -> NHWC
    N, H, W, Cin = x.shape
    hidden = p["w_exp"].shape[-1]
    Cout = p["w_proj"].shape[-1]
    reduced = p["w_se1"].shape[-1]
    assert Cin == Cout, "residual path requires in_channels == out_channels"
    assert W & (W - 1) == 0, "SE lane-fold assumes W is a power of two"

    # Folded BN params (inference).
    s1, b1 = fold_bn(p["bn1_g"], p["bn1_b"], p["bn1_m"], p["bn1_v"])
    s2, b2 = fold_bn(p["bn2_g"], p["bn2_b"], p["bn2_m"], p["bn2_v"])
    s3, b3 = fold_bn(p["bn3_g"], p["bn3_b"], p["bn3_m"], p["bn3_v"])

    # Lane-dense activations.
    x_dense = x.reshape(N, H, W * Cin)                                # (N, H, W*Cin)

    # Expand conv as 3 banded row-matrices (kh = 0..2), BN1 scale folded, bf16 MXU weights.
    #   Wrow[kh][x_in*Cin+ci, x_out*hidden+co] = w_exp[kh, x_in-x_out+1, ci, co] * s1[co]
    w_exp_s = p["w_exp"] * s1.reshape(1, 1, 1, hidden)                # (3,3,Cin,hidden)
    rows = []
    for kh in range(3):
        m = jnp.zeros((W * Cin, W * hidden), jnp.float32)
        for kw in range(3):
            band = jnp.eye(W, k=1 - kw, dtype=jnp.float32)            # 1 at (x_in, x_out=x_in+1-kw)
            blk = w_exp_s[kh, kw]                                      # (Cin, hidden)
            m = m + (band[:, None, :, None] * blk[None, :, None, :]
                     ).reshape(W * Cin, W * hidden)
        rows.append(m)
    w_exp_rows = jnp.stack(rows, axis=0).astype(jnp.bfloat16)          # (3, W*Cin, W*hidden)

    # Depthwise weights: BN2 scale folded, lane-tiled (stays f32 for VPU FMAs).
    w_dw_s = p["w_dw"] * s2.reshape(1, 1, hidden)
    wd_tiled = jnp.tile(w_dw_s.reshape(9, hidden), (1, W))             # (9, W*hidden)

    # 1x1 projection as block-diagonal lane-dense weight, BN3 scale folded, bf16.
    wp_s = p["w_proj"] * s3.reshape(1, Cout)                           # (hidden, Cout)
    eyeW = jnp.eye(W, dtype=jnp.float32)
    wp_bd = (eyeW[:, None, :, None] * wp_s[None, :, None, :]
             ).reshape(W * hidden, W * Cout).astype(jnp.bfloat16)      # (W*hidden, W*Cout)

    # Biases, pre-tiled to the lane-dense views.
    b1_t = jnp.tile(b1.reshape(1, hidden), (1, W))                     # (1, W*hidden)
    b2_t = jnp.tile(b2.reshape(1, hidden), (1, W))                     # (1, W*hidden)
    b3_t = jnp.tile(b3.reshape(1, Cout), (1, W))                       # (1, W*Cout)

    # SE params.
    w1t = p["w_se1"].T                                                 # (R, hidden)
    bse1 = p["b_se1"].reshape(reduced, 1)
    w2 = p["w_se2"]                                                    # (R, hidden)
    bse2 = p["b_se2"].reshape(1, hidden)

    kernel = functools.partial(fused_mbconv_kernel, H, W, Cin, hidden, Cout)

    out_dense = pl.pallas_call(
        kernel,
        out_shape=jax.ShapeDtypeStruct((N, H, W * Cout), jnp.float32),
        grid=(N,),
        in_specs=[pl.BlockSpec((1, H, W * Cin), lambda n: (n, 0, 0)),
                  _rep(w_exp_rows.shape), _rep(b1_t.shape),
                  _rep(wd_tiled.shape), _rep(b2_t.shape),
                  _rep(w1t.shape), _rep(bse1.shape), _rep(w2.shape), _rep(bse2.shape),
                  _rep(wp_bd.shape), _rep(b3_t.shape)],
        out_specs=pl.BlockSpec((1, H, W * Cout), lambda n: (n, 0, 0)),
        scratch_shapes=[pltpu.VMEM((H + 2, W * Cin), jnp.float32),        # row-padded x
                        pltpu.VMEM((3 * (H + 2), W * hidden), jnp.float32)],  # padded, x-shifted act
        compiler_params=pltpu.CompilerParams(dimension_semantics=("parallel",)),
    )(x_dense, w_exp_rows, b1_t, wd_tiled, b2_t, w1t, bse1, w2, bse2, wp_bd, b3_t)

    out = out_dense.reshape(N, H, W, Cout)
    return jnp.transpose(out, (0, 3, 1, 2))                            # NHWC -> NCHW


# --------------------------- pure-JAX reference ------------------------------ #

def reference_forward(x_nchw, p):
    x = jnp.transpose(x_nchw, (0, 2, 3, 1)).astype(jnp.float32)
    dn = ("NHWC", "HWIO", "NHWC")

    def bn(y, g, b, m, v, eps=1e-5):
        return (y - m) / jnp.sqrt(v + eps) * g + b

    def silu(y):
        return y * jax.nn.sigmoid(y)

    h = lax.conv_general_dilated(x, p["w_exp"], (1, 1), ((1, 1), (1, 1)),
                                 dimension_numbers=dn)
    h = silu(bn(h, p["bn1_g"], p["bn1_b"], p["bn1_m"], p["bn1_v"]))
    hidden = h.shape[-1]
    h = lax.conv_general_dilated(h, p["w_dw"][:, :, None, :], (1, 1), ((1, 1), (1, 1)),
                                 dimension_numbers=dn, feature_group_count=hidden)
    h = silu(bn(h, p["bn2_g"], p["bn2_b"], p["bn2_m"], p["bn2_v"]))
    pooled = jnp.mean(h, axis=(1, 2))                                 # (N, hidden)
    s = silu(pooled @ p["w_se1"] + p["b_se1"])
    g = jax.nn.sigmoid(s @ p["w_se2"] + p["b_se2"])
    h = h * g[:, None, None, :]
    proj = jnp.einsum("nhwc,co->nhwo", h, p["w_proj"])
    out = bn(proj, p["bn3_g"], p["bn3_b"], p["bn3_m"], p["bn3_v"]) + x
    return jnp.transpose(out, (0, 3, 1, 2))


# ----------------------------------- main ------------------------------------ #

if __name__ == "__main__":
    # Config (use_residual: in==out, stride==1). W*Cin = 16*8 = 128 -> lane-dense blocks.
    N, Cin, H, W = 2, 8, 16, 16
    expand_ratio, reduction = 4, 4
    Cout = Cin
    hidden = Cin * expand_ratio          # 32
    reduced = int(Cin / reduction)       # 2

    key = jax.random.PRNGKey(0)
    ks = jax.random.split(key, 20)

    p = {
        "w_exp": 0.1 * jax.random.normal(ks[0], (3, 3, Cin, hidden), jnp.float32),
        "bn1_g": 1.0 + 0.1 * jax.random.normal(ks[1], (hidden,), jnp.float32),
        "bn1_b": 0.1 * jax.random.normal(ks[2], (hidden,), jnp.float32),
        "bn1_m": 0.05 * jax.random.normal(ks[3], (hidden,), jnp.float32),
        "bn1_v": 1.0 + 0.1 * jax.random.uniform(ks[4], (hidden,), jnp.float32),

        "w_dw": 0.1 * jax.random.normal(ks[5], (3, 3, hidden), jnp.float32),
        "bn2_g": 1.0 + 0.1 * jax.random.normal(ks[6], (hidden,), jnp.float32),
        "bn2_b": 0.1 * jax.random.normal(ks[7], (hidden,), jnp.float32),
        "bn2_m": 0.05 * jax.random.normal(ks[8], (hidden,), jnp.float32),
        "bn2_v": 1.0 + 0.1 * jax.random.uniform(ks[9], (hidden,), jnp.float32),

        "w_se1": 0.1 * jax.random.normal(ks[10], (hidden, reduced), jnp.float32),
        "b_se1": 0.1 * jax.random.normal(ks[11], (reduced,), jnp.float32),
        "w_se2": 0.1 * jax.random.normal(ks[12], (reduced, hidden), jnp.float32),
        "b_se2": 0.1 * jax.random.normal(ks[13], (hidden,), jnp.float32),

        "w_proj": 0.1 * jax.random.normal(ks[14], (hidden, Cout), jnp.float32),
        "bn3_g": 1.0 + 0.1 * jax.random.normal(ks[15], (Cout,), jnp.float32),
        "bn3_b": 0.1 * jax.random.normal(ks[16], (Cout,), jnp.float32),
        "bn3_m": 0.05 * jax.random.normal(ks[17], (Cout,), jnp.float32),
        "bn3_v": 1.0 + 0.1 * jax.random.uniform(ks[18], (Cout,), jnp.float32),
    }

    x = jax.random.normal(ks[19], (N, Cin, H, W), jnp.float32)   # NCHW like PyTorch

    out = jax.block_until_ready(inverted_residual_forward(x, p))
    ref = jax.block_until_ready(reference_forward(x, p))

    assert out.shape == (N, Cout, H, W)
    # bf16 MXU operands (f32 accumulation) -> slightly looser tolerance than pure f32.
    np.testing.assert_allclose(np.asarray(out), np.asarray(ref), rtol=2e-2, atol=2e-2)

    print("KERNEL_OK")
</pallas_src>

<mosaic_0001>
module attributes {stable_mosaic.version = 11 : i64} {
  func.func @fused_mbconv_kernel(%arg0: i32, %arg1: memref<1x16x128xf32, #tpu.memory_space<vmem>>, %arg2: memref<3x128x512xbf16, #tpu.memory_space<vmem>>, %arg3: memref<1x512xf32, #tpu.memory_space<vmem>>, %arg4: memref<9x512xf32, #tpu.memory_space<vmem>>, %arg5: memref<1x512xf32, #tpu.memory_space<vmem>>, %arg6: memref<2x32xf32, #tpu.memory_space<vmem>>, %arg7: memref<2x1xf32, #tpu.memory_space<vmem>>, %arg8: memref<2x32xf32, #tpu.memory_space<vmem>>, %arg9: memref<1x32xf32, #tpu.memory_space<vmem>>, %arg10: memref<512x128xbf16, #tpu.memory_space<vmem>>, %arg11: memref<1x128xf32, #tpu.memory_space<vmem>>, %arg12: memref<1x16x128xf32, #tpu.memory_space<vmem>>, %arg13: memref<18x128xf32, #tpu.memory_space<vmem>>, %arg14: memref<54x512xf32, #tpu.memory_space<vmem>>) attributes {dimension_semantics = [#tpu.dimension_semantics<parallel>], iteration_bounds = array<i64: 2>, scalar_prefetch = 0 : i64, scratch_operands = 2 : i64, tpu.core_type = #tpu.core_type<tc>, window_params = [{transform_indices = @transform_0, window_bounds = array<i64: 1, 16, 128>}, {pipeline_mode = #tpu.pipeline_mode<synchronous>, transform_indices = @transform_1, window_bounds = array<i64: 3, 128, 512>}, {pipeline_mode = #tpu.pipeline_mode<synchronous>, transform_indices = @transform_2, window_bounds = array<i64: 1, 512>}, {pipeline_mode = #tpu.pipeline_mode<synchronous>, transform_indices = @transform_3, window_bounds = array<i64: 9, 512>}, {pipeline_mode = #tpu.pipeline_mode<synchronous>, transform_indices = @transform_4, window_bounds = array<i64: 1, 512>}, {pipeline_mode = #tpu.pipeline_mode<synchronous>, transform_indices = @transform_5, window_bounds = array<i64: 2, 32>}, {pipeline_mode = #tpu.pipeline_mode<synchronous>, transform_indices = @transform_6, window_bounds = array<i64: 2, 1>}, {pipeline_mode = #tpu.pipeline_mode<synchronous>, transform_indices = @transform_7, window_bounds = array<i64: 2, 32>}, {pipeline_mode = #tpu.pipeline_mode<synchronous>, transform_indices = @transform_8, window_bounds = array<i64: 1, 32>}, {pipeline_mode = #tpu.pipeline_mode<synchronous>, transform_indices = @transform_9, window_bounds = array<i64: 512, 128>}, {pipeline_mode = #tpu.pipeline_mode<synchronous>, transform_indices = @transform_10, window_bounds = array<i64: 1, 128>}, {transform_indices = @transform_11, window_bounds = array<i64: 1, 16, 128>}]} {
    %c0 = arith.constant 0 : index
    %c0_0 = arith.constant 0 : index
    %c0_1 = arith.constant 0 : index
    %0 = vector.load %arg1[%c0, %c0_0, %c0_1] : memref<1x16x128xf32, #tpu.memory_space<vmem>>, vector<1x16x128xf32>
    %1 = vector.shape_cast %0 : vector<1x16x128xf32> to vector<16x128xf32>
    %cst = arith.constant 0.000000e+00 : f32
    %2 = vector.broadcast %cst : f32 to vector<1x128xf32>
    %c0_2 = arith.constant 0 : index
    %c0_3 = arith.constant 0 : index
    %3 = vector.load %arg13[%c0_2, %c0_3] : memref<18x128xf32, #tpu.memory_space<vmem>>, vector<1x128xf32>
    tpu.vector_store %arg13[%c0_2, %c0_3], %2 {strides = array<i32>} : memref<18x128xf32, #tpu.memory_space<vmem>>, vector<1x128xf32>,
    %c17 = arith.constant 17 : index
    %c0_4 = arith.constant 0 : index
    %4 = vector.load %arg13[%c17, %c0_4] : memref<18x128xf32, #tpu.memory_space<vmem>>, vector<1x128xf32>
    tpu.vector_store %arg13[%c17, %c0_4], %2 {strides = array<i32>} : memref<18x128xf32, #tpu.memory_space<vmem>>, vector<1x128xf32>,
    %c1 = arith.constant 1 : index
    %c0_5 = arith.constant 0 : index
    %5 = vector.load %arg13[%c1, %c0_5] : memref<18x128xf32, #tpu.memory_space<vmem>>, vector<16x128xf32>
    tpu.vector_store %arg13[%c1, %c0_5], %1 {strides = array<i32>} : memref<18x128xf32, #tpu.memory_space<vmem>>, vector<16x128xf32>,
    %cst_6 = arith.constant 0.000000e+00 : f32
    %6 = vector.broadcast %cst_6 : f32 to vector<16x512xf32>
    %c0_7 = arith.constant 0 : index
    %c0_8 = arith.constant 0 : index
    %7 = vector.load %arg13[%c0_7, %c0_8] : memref<18x128xf32, #tpu.memory_space<vmem>>, vector<16x128xf32>
    %8 = arith.truncf %7 : vector<16x128xf32> to vector<16x128xbf16>
    %c0_9 = arith.constant 0 : index
    %c0_10 = arith.constant 0 : index
    %c0_11 = arith.constant 0 : index
    %9 = vector.load %arg2[%c0_9, %c0_10, %c0_11] : memref<3x128x512xbf16, #tpu.memory_space<vmem>>, vector<1x128x512xbf16>
    %10 = vector.shape_cast %9 : vector<1x128x512xbf16> to vector<128x512xbf16>
    %cst_12 = arith.constant dense<0.000000e+00> : vector<16x512xf32>
    %11 = tpu.matmul %8, %10, %cst_12 {dimension_numbers = #tpu.dot_dimension_numbers<[1], [0], [0], [1], [0, 0, 1, 1], [], []>} : vector<16x128xbf16>, vector<128x512xbf16>, vector<16x512xf32> -> vector<16x512xf32>
    %12 = arith.addf %6, %11 : vector<16x512xf32>
    %c1_13 = arith.constant 1 : index
    %c0_14 = arith.constant 0 : index
    %13 = vector.load %arg13[%c1_13, %c0_14] : memref<18x128xf32, #tpu.memory_space<vmem>>, vector<16x128xf32>
    %14 = arith.truncf %13 : vector<16x128xf32> to vector<16x128xbf16>
    %c1_15 = arith.constant 1 : index
    %c0_16 = arith.constant 0 : index
    %c0_17 = arith.constant 0 : index
    %15 = vector.load %arg2[%c1_15, %c0_16, %c0_17] : memref<3x128x512xbf16, #tpu.memory_space<vmem>>, vector<1x128x512xbf16>
    %16 = vector.shape_cast %15 : vector<1x128x512xbf16> to vector<128x512xbf16>
    %cst_18 = arith.constant dense<0.000000e+00> : vector<16x512xf32>
    %17 = tpu.matmul %14, %16, %cst_18 {dimension_numbers = #tpu.dot_dimension_numbers<[1], [0], [0], [1], [0, 0, 1, 1], [], []>} : vector<16x128xbf16>, vector<128x512xbf16>, vector<16x512xf32> -> vector<16x512xf32>
    %18 = arith.addf %12, %17 : vector<16x512xf32>
    %c2 = arith.constant 2 : index
    %c0_19 = arith.constant 0 : index
    %19 = vector.load %arg13[%c2, %c0_19] : memref<18x128xf32, #tpu.memory_space<vmem>>, vector<16x128xf32>
    %20 = arith.truncf %19 : vector<16x128xf32> to vector<16x128xbf16>
    %c2_20 = arith.constant 2 : index
    %c0_21 = arith.constant 0 : index
    %c0_22 = arith.constant 0 : index
    %21 = vector.load %arg2[%c2_20, %c0_21, %c0_22] : memref<3x128x512xbf16, #tpu.memory_space<vmem>>, vector<1x128x512xbf16>
    %22 = vector.shape_cast %21 : vector<1x128x512xbf16> to vector<128x512xbf16>
    %cst_23 = arith.constant dense<0.000000e+00> : vector<16x512xf32>
    %23 = tpu.matmul %20, %22, %cst_23 {dimension_numbers = #tpu.dot_dimension_numbers<[1], [0], [0], [1], [0, 0, 1, 1], [], []>} : vector<16x128xbf16>, vector<128x512xbf16>, vector<16x512xf32> -> vector<16x512xf32>
    %24 = arith.addf %18, %23 : vector<16x512xf32>
    %c0_24 = arith.constant 0 : index
    %c0_25 = arith.constant 0 : index
    %25 = vector.load %arg3[%c0_24, %c0_25] : memref<1x512xf32, #tpu.memory_space<vmem>>, vector<1x512xf32>
    %26 = vector.broadcast %25 : vector<1x512xf32> to vector<16x512xf32>
    %27 = arith.addf %24, %26 : vector<16x512xf32>
    %28 = arith.negf %27 : vector<16x512xf32>
    %29 = math.exp %28 : vector<16x512xf32>
    %cst_26 = arith.constant 1.000000e+00 : f32
    %30 = vector.broadcast %cst_26 : f32 to vector<16x512xf32>
    %31 = arith.addf %30, %29 : vector<16x512xf32>
    %32 = arith.divf %30, %31 : vector<16x512xf32>
    %33 = arith.mulf %27, %32 : vector<16x512xf32>
    %cst_27 = arith.constant 0.000000e+00 : f32
    %34 = vector.broadcast %cst_27 : f32 to vector<16x32xf32>
    %35 = vector.extract_strided_slice %33 {offsets = [0, 0], sizes = [16, 480], strides = [1, 1]} : vector<16x512xf32> to vector<16x480xf32>
    %36 = tpu.concatenate %34, %35 in 1 : vector<16x32xf32>, vector<16x480xf32> -> vector<16x512xf32>
    %37 = vector.extract_strided_slice %33 {offsets = [0, 32], sizes = [16, 480], strides = [1, 1]} : vector<16x512xf32> to vector<16x480xf32>
    %38 = tpu.concatenate %37, %34 in 1 : vector<16x480xf32>, vector<16x32xf32> -> vector<16x512xf32>
    %cst_28 = arith.constant 0.000000e+00 : f32
    %39 = vector.broadcast %cst_28 : f32 to vector<1x512xf32>
    %c0_29 = arith.constant 0 : index
    %c0_30 = arith.constant 0 : index
    %40 = vector.load %arg14[%c0_29, %c0_30] : memref<54x512xf32, #tpu.memory_space<vmem>>, vector<1x512xf32>
    tpu.vector_store %arg14[%c0_29, %c0_30], %39 {strides = array<i32>} : memref<54x512xf32, #tpu.memory_space<vmem>>, vector<1x512xf32>,
    %c17_31 = arith.constant 17 : index
    %c0_32 = arith.constant 0 : index
    %41 = vector.load %arg14[%c17_31, %c0_32] : memref<54x512xf32, #tpu.memory_space<vmem>>, vector<1x512xf32>
    tpu.vector_store %arg14[%c17_31, %c0_32], %39 {strides = array<i32>} : memref<54x512xf32, #tpu.memory_space<vmem>>, vector<1x512xf32>,
    %c1_33 = arith.constant 1 : index
    %c0_34 = arith.constant 0 : index
    %42 = vector.load %arg14[%c1_33, %c0_34] : memref<54x512xf32, #tpu.memory_space<vmem>>, vector<16x512xf32>
    tpu.vector_store %arg14[%c1_33, %c0_34], %36 {strides = array<i32>} : memref<54x512xf32, #tpu.memory_space<vmem>>, vector<16x512xf32>,
    %c18 = arith.constant 18 : index
    %c0_35 = arith.constant 0 : index
    %43 = vector.load %arg14[%c18, %c0_35] : memref<54x512xf32, #tpu.memory_space<vmem>>, vector<1x512xf32>
    tpu.vector_store %arg14[%c18, %c0_35], %39 {strides = array<i32>} : memref<54x512xf32, #tpu.memory_space<vmem>>, vector<1x512xf32>,
    %c35 = arith.constant 35 : index
    %c0_36 = arith.constant 0 : index
    %44 = vector.load %arg14[%c35, %c0_36] : memref<54x512xf32, #tpu.memory_space<vmem>>, vector<1x512xf32>
    tpu.vector_store %arg14[%c35, %c0_36], %39 {strides = array<i32>} : memref<54x512xf32, #tpu.memory_space<vmem>>, vector<1x512xf32>,
    %c19 = arith.constant 19 : index
    %c0_37 = arith.constant 0 : index
    %45 = vector.load %arg14[%c19, %c0_37] : memref<54x512xf32, #tpu.memory_space<vmem>>, vector<16x512xf32>
    tpu.vector_store %arg14[%c19, %c0_37], %33 {strides = array<i32>} : memref<54x512xf32, #tpu.memory_space<vmem>>, vector<16x512xf32>,
    %c36 = arith.constant 36 : index
    %c0_38 = arith.constant 0 : index
    %46 = vector.load %arg14[%c36, %c0_38] : memref<54x512xf32, #tpu.memory_space<vmem>>, vector<1x512xf32>
    tpu.vector_store %arg14[%c36, %c0_38], %39 {strides = array<i32>} : memref<54x512xf32, #tpu.memory_space<vmem>>, vector<1x512xf32>,
    %c53 = arith.constant 53 : index
    %c0_39 = arith.constant 0 : index
    %47 = vector.load %arg14[%c53, %c0_39] : memref<54x512xf32, #tpu.memory_space<vmem>>, vector<1x512xf32>
    tpu.vector_store %arg14[%c53, %c0_39], %39 {strides = array<i32>} : memref<54x512xf32, #tpu.memory_space<vmem>>, vector<1x512xf32>,
    %c37 = arith.constant 37 : index
    %c0_40 = arith.constant 0 : index
    %48 = vector.load %arg14[%c37, %c0_40] : memref<54x512xf32, #tpu.memory_space<vmem>>, vector<16x512xf32>
    tpu.vector_store %arg14[%c37, %c0_40], %38 {strides = array<i32>} : memref<54x512xf32, #tpu.memory_space<vmem>>, vector<16x512xf32>,
    %c0_41 = arith.constant 0 : index
    %c0_42 = arith.constant 0 : index
    %49 = vector.load %arg4[%c0_41, %c0_42] : memref<9x512xf32, #tpu.memory_space<vmem>>, vector<9x512xf32>
    %cst_43 = arith.constant 0.000000e+00 : f32
    %50 = vector.broadcast %cst_43 : f32 to vector<16x512xf32>
    %c0_44 = arith.constant 0 : index
    %c0_45 = arith.constant 0 : index
    %51 = vector.load %arg14[%c0_44, %c0_45] : memref<54x512xf32, #tpu.memory_space<vmem>>, vector<16x512xf32>
    %52 = vector.extract_strided_slice %49 {offsets = [0, 0], sizes = [1, 512], strides = [1, 1]} : vector<9x512xf32> to vector<1x512xf32>
    %53 = vector.broadcast %52 : vector<1x512xf32> to vector<16x512xf32>
    %54 = arith.mulf %51, %53 : vector<16x512xf32>
    %55 = arith.addf %50, %54 : vector<16x512xf32>
    %c18_46 = arith.constant 18 : index
    %c0_47 = arith.constant 0 : index
    %56 = vector.load %arg14[%c18_46, %c0_47] : memref<54x512xf32, #tpu.memory_space<vmem>>, vector<16x512xf32>
    %57 = vector.extract_strided_slice %49 {offsets = [1, 0], sizes = [1, 512], strides = [1, 1]} : vector<9x512xf32> to vector<1x512xf32>
    %58 = vector.broadcast %57 : vector<1x512xf32> to vector<16x512xf32>
    %59 = arith.mulf %56, %58 : vector<16x512xf32>
    %60 = arith.addf %55, %59 : vector<16x512xf32>
    %c36_48 = arith.constant 36 : index
    %c0_49 = arith.constant 0 : index
    %61 = vector.load %arg14[%c36_48, %c0_49] : memref<54x512xf32, #tpu.memory_space<vmem>>, vector<16x512xf32>
    %62 = vector.extract_strided_slice %49 {offsets = [2, 0], sizes = [1, 512], strides = [1, 1]} : vector<9x512xf32> to vector<1x512xf32>
    %63 = vector.broadcast %62 : vector<1x512xf32> to vector<16x512xf32>
    %64 = arith.mulf %61, %63 : vector<16x512xf32>
    %65 = arith.addf %60, %64 : vector<16x512xf32>
    %c1_50 = arith.constant 1 : index
    %c0_51 = arith.constant 0 : index
    %66 = vector.load %arg14[%c1_50, %c0_51] : memref<54x512xf32, #tpu.memory_space<vmem>>, vector<16x512xf32>
    %67 = vector.extract_strided_slice %49 {offsets = [3, 0], sizes = [1, 512], strides = [1, 1]} : vector<9x512xf32> to vector<1x512xf32>
    %68 = vector.broadcast %67 : vector<1x512xf32> to vector<16x512xf32>
    %69 = arith.mulf %66, %68 : vector<16x512xf32>
    %70 = arith.addf %65, %69 : vector<16x512xf32>
    %c19_52 = arith.constant 19 : index
    %c0_53 = arith.constant 0 : index
    %71 = vector.load %arg14[%c19_52, %c0_53] : memref<54x512xf32, #tpu.memory_space<vmem>>, vector<16x512xf32>
    %72 = vector.extract_strided_slice %49 {offsets = [4, 0], sizes = [1, 512], strides = [1, 1]} : vector<9x512xf32> to vector<1x512xf32>
    %73 = vector.broadcast %72 : vector<1x512xf32> to vector<16x512xf32>
    %74 = arith.mulf %71, %73 : vector<16x512xf32>
    %75 = arith.addf %70, %74 : vector<16x512xf32>
    %c37_54 = arith.constant 37 : index
    %c0_55 = arith.constant 0 : index
    %76 = vector.load %arg14[%c37_54, %c0_55] : memref<54x512xf32, #tpu.memory_space<vmem>>, vector<16x512xf32>
    %77 = vector.extract_strided_slice %49 {offsets = [5, 0], sizes = [1, 512], strides = [1, 1]} : vector<9x512xf32> to vector<1x512xf32>
    %78 = vector.broadcast %77 : vector<1x512xf32> to vector<16x512xf32>
    %79 = arith.mulf %76, %78 : vector<16x512xf32>
    %80 = arith.addf %75, %79 : vector<16x512xf32>
    %c2_56 = arith.constant 2 : index
    %c0_57 = arith.constant 0 : index
    %81 = vector.load %arg14[%c2_56, %c0_57] : memref<54x512xf32, #tpu.memory_space<vmem>>, vector<16x512xf32>
    %82 = vector.extract_strided_slice %49 {offsets = [6, 0], sizes = [1, 512], strides = [1, 1]} : vector<9x512xf32> to vector<1x512xf32>
    %83 = vector.broadcast %82 : vector<1x512xf32> to vector<16x512xf32>
    %84 = arith.mulf %81, %83 : vector<16x512xf32>
    %85 = arith.addf %80, %84 : vector<16x512xf32>
    %c20 = arith.constant 20 : index
    %c0_58 = arith.constant 0 : index
    %86 = vector.load %arg14[%c20, %c0_58] : memref<54x512xf32, #tpu.memory_space<vmem>>, vector<16x512xf32>
    %87 = vector.extract_strided_slice %49 {offsets = [7, 0], sizes = [1, 512], strides = [1, 1]} : vector<9x512xf32> to vector<1x512xf32>
    %88 = vector.broadcast %87 : vector<1x512xf32> to vector<16x512xf32>
    %89 = arith.mulf %86, %88 : vector<16x512xf32>
    %90 = arith.addf %85, %89 : vector<16x512xf32>
    %c38 = arith.constant 38 : index
    %c0_59 = arith.constant 0 : index
    %91 = vector.load %arg14[%c38, %c0_59] : memref<54x512xf32, #tpu.memory_space<vmem>>, vector<16x512xf32>
    %92 = vector.extract_strided_slice %49 {offsets = [8, 0], sizes = [1, 512], strides = [1, 1]} : vector<9x512xf32> to vector<1x512xf32>
    %93 = vector.broadcast %92 : vector<1x512xf32> to vector<16x512xf32>
    %94 = arith.mulf %91, %93 : vector<16x512xf32>
    %95 = arith.addf %90, %94 : vector<16x512xf32>
    %c0_60 = arith.constant 0 : index
    %c0_61 = arith.constant 0 : index
    %96 = vector.load %arg5[%c0_60, %c0_61] : memref<1x512xf32, #tpu.memory_space<vmem>>, vector<1x512xf32>
    %97 = vector.broadcast %96 : vector<1x512xf32> to vector<16x512xf32>
    %98 = arith.addf %95, %97 : vector<16x512xf32>
    %99 = arith.negf %98 : vector<16x512xf32>
    %100 = math.exp %99 : vector<16x512xf32>
    %cst_62 = arith.constant 1.000000e+00 : f32
    %101 = vector.broadcast %cst_62 : f32 to vector<16x512xf32>
    %102 = arith.addf %101, %100 : vector<16x512xf32>
    %103 = arith.divf %101, %102 : vector<16x512xf32>
    %104 = arith.mulf %98, %103 : vector<16x512xf32>
    %cst_63 = arith.constant dense<0.000000e+00> : vector<512xf32>
    %105 = vector.multi_reduction <add>, %104, %cst_63 [0] : vector<16x512xf32> to vector<512xf32>
    %106 = vector.shape_cast %105 : vector<512xf32> to vector<1x512xf32>
    %107 = vector.extract_strided_slice %106 {offsets = [0, 0], sizes = [1, 256], strides = [1, 1]} : vector<1x512xf32> to vector<1x256xf32>
    %108 = vector.extract_strided_slice %106 {offsets = [0, 256], sizes = [1, 256], strides = [1, 1]} : vector<1x512xf32> to vector<1x256xf32>
    %109 = arith.addf %107, %108 : vector<1x256xf32>
    %110 = vector.extract_strided_slice %109 {offsets = [0, 0], sizes = [1, 128], strides = [1, 1]} : vector<1x256xf32> to vector<1x128xf32>
    %111 = vector.extract_strided_slice %109 {offsets = [0, 128], sizes = [1, 128], strides = [1, 1]} : vector<1x256xf32> to vector<1x128xf32>
    %112 = arith.addf %110, %111 : vector<1x128xf32>
    %113 = vector.extract_strided_slice %112 {offsets = [0, 0], sizes = [1, 64], strides = [1, 1]} : vector<1x128xf32> to vector<1x64xf32>
    %114 = vector.extract_strided_slice %112 {offsets = [0, 64], sizes = [1, 64], strides = [1, 1]} : vector<1x128xf32> to vector<1x64xf32>
    %115 = arith.addf %113, %114 : vector<1x64xf32>
    %116 = vector.extract_strided_slice %115 {offsets = [0, 0], sizes = [1, 32], strides = [1, 1]} : vector<1x64xf32> to vector<1x32xf32>
    %117 = vector.extract_strided_slice %115 {offsets = [0, 32], sizes = [1, 32], strides = [1, 1]} : vector<1x64xf32> to vector<1x32xf32>
    %118 = arith.addf %116, %117 : vector<1x32xf32>
    %cst_64 = arith.constant 3.906250e-03 : f32
    %119 = vector.broadcast %cst_64 : f32 to vector<1x32xf32>
    %120 = arith.mulf %118, %119 : vector<1x32xf32>
    %c0_65 = arith.constant 0 : index
    %c0_66 = arith.constant 0 : index
    %121 = vector.load %arg6[%c0_65, %c0_66] : memref<2x32xf32, #tpu.memory_space<vmem>>, vector<2x32xf32>
    %122 = vector.broadcast %120 : vector<1x32xf32> to vector<2x32xf32>
    %123 = arith.mulf %121, %122 : vector<2x32xf32>
    %cst_67 = arith.constant dense<0.000000e+00> : vector<2xf32>
    %124 = vector.multi_reduction <add>, %123, %cst_67 [1] : vector<2x32xf32> to vector<2xf32>
    %125 = vector.shape_cast %124 : vector<2xf32> to vector<2x1xf32>
    %c0_68 = arith.constant 0 : index
    %c0_69 = arith.constant 0 : index
    %126 = vector.load %arg7[%c0_68, %c0_69] : memref<2x1xf32, #tpu.memory_space<vmem>>, vector<2x1xf32>
    %127 = arith.addf %125, %126 : vector<2x1xf32>
    %128 = arith.negf %127 : vector<2x1xf32>
    %129 = math.exp %128 : vector<2x1xf32>
    %cst_70 = arith.constant 1.000000e+00 : f32
    %130 = vector.broadcast %cst_70 : f32 to vector<2x1xf32>
    %131 = arith.addf %130, %129 : vector<2x1xf32>
    %132 = arith.divf %130, %131 : vector<2x1xf32>
    %133 = arith.mulf %127, %132 : vector<2x1xf32>
    %c0_71 = arith.constant 0 : index
    %c0_72 = arith.constant 0 : index
    %134 = vector.load %arg8[%c0_71, %c0_72] : memref<2x32xf32, #tpu.memory_space<vmem>>, vector<2x32xf32>
    %135 = vector.broadcast %133 : vector<2x1xf32> to vector<2x32xf32>
    %136 = arith.mulf %134, %135 : vector<2x32xf32>
    %cst_73 = arith.constant dense<0.000000e+00> : vector<32xf32>
    %137 = vector.multi_reduction <add>, %136, %cst_73 [0] : vector<2x32xf32> to vector<32xf32>
    %138 = vector.shape_cast %137 : vector<32xf32> to vector<1x32xf32>
    %c0_74 = arith.constant 0 : index
    %c0_75 = arith.constant 0 : index
    %139 = vector.load %arg9[%c0_74, %c0_75] : memref<1x32xf32, #tpu.memory_space<vmem>>, vector<1x32xf32>
    %140 = arith.addf %138, %139 : vector<1x32xf32>
    %141 = arith.negf %140 : vector<1x32xf32>
    %142 = math.exp %141 : vector<1x32xf32>
    %cst_76 = arith.constant 1.000000e+00 : f32
    %143 = vector.broadcast %cst_76 : f32 to vector<1x32xf32>
    %144 = arith.addf %143, %142 : vector<1x32xf32>
    %145 = arith.divf %143, %144 : vector<1x32xf32>
    %146 = tpu.concatenate %145, %145, %145, %145, %145, %145, %145, %145, %145, %145, %145, %145, %145, %145, %145, %145 in 1 : vector<1x32xf32>, vector<1x32xf32>, vector<1x32xf32>, vector<1x32xf32>, vector<1x32xf32>, vector<1x32xf32>, vector<1x32xf32>, vector<1x32xf32>, vector<1x32xf32>, vector<1x32xf32>, vector<1x32xf32>, vector<1x32xf32>, vector<1x32xf32>, vector<1x32xf32>, vector<1x32xf32>, vector<1x32xf32> -> vector<1x512xf32>
    %147 = vector.broadcast %146 : vector<1x512xf32> to vector<16x512xf32>
    %148 = arith.mulf %104, %147 : vector<16x512xf32>
    %149 = arith.truncf %148 : vector<16x512xf32> to vector<16x512xbf16>
    %c0_77 = arith.constant 0 : index
    %c0_78 = arith.constant 0 : index
    %150 = vector.load %arg10[%c0_77, %c0_78] : memref<512x128xbf16, #tpu.memory_space<vmem>>, vector<512x128xbf16>
    %cst_79 = arith.constant dense<0.000000e+00> : vector<16x128xf32>
    %151 = tpu.matmul %149, %150, %cst_79 {dimension_numbers = #tpu.dot_dimension_numbers<[1], [0], [0], [1], [0, 0, 1, 1], [], []>} : vector<16x512xbf16>, vector<512x128xbf16>, vector<16x128xf32> -> vector<16x128xf32>
    %c0_80 = arith.constant 0 : index
    %c0_81 = arith.constant 0 : index
    %152 = vector.load %arg11[%c0_80, %c0_81] : memref<1x128xf32, #tpu.memory_space<vmem>>, vector<1x128xf32>
    %153 = vector.broadcast %152 : vector<1x128xf32> to vector<16x128xf32>
    %154 = arith.addf %151, %153 : vector<16x128xf32>
    %155 = arith.addf %154, %1 : vector<16x128xf32>
    %156 = vector.shape_cast %155 : vector<16x128xf32> to vector<1x16x128xf32>
    %c0_82 = arith.constant 0 : index
    %c0_83 = arith.constant 0 : index
    %c0_84 = arith.constant 0 : index
    %157 = vector.load %arg12[%c0_82, %c0_83, %c0_84] : memref<1x16x128xf32, #tpu.memory_space<vmem>>, vector<1x16x128xf32>
    tpu.vector_store %arg12[%c0_82, %c0_83, %c0_84], %156 {strides = array<i32>} : memref<1x16x128xf32, #tpu.memory_space<vmem>>, vector<1x16x128xf32>,
    return
  }
  func.func @transform_0(%arg0: i32) -> (i32, i32, i32) {
    %c0_i32 = arith.constant 0 : i32
    %c0_i32_0 = arith.constant 0 : i32
    %c0_i32_1 = arith.constant 0 : i32
    return %arg0, %c0_i32, %c0_i32_0 : i32, i32, i32
  }
  func.func @transform_1(%arg0: i32) -> (i32, i32, i32) {
    %c0_i32 = arith.constant 0 : i32
    %c0_i32_0 = arith.constant 0 : i32
    %c0_i32_1 = arith.constant 0 : i32
    %c0_i32_2 = arith.constant 0 : i32
    return %c0_i32, %c0_i32_0, %c0_i32_1 : i32, i32, i32
  }
  func.func @transform_2(%arg0: i32) -> (i32, i32) {
    %c0_i32 = arith.constant 0 : i32
    %c0_i32_0 = arith.constant 0 : i32
    %c0_i32_1 = arith.constant 0 : i32
    return %c0_i32, %c0_i32_0 : i32, i32
  }
  func.func @transform_3(%arg0: i32) -> (i32, i32) {
    %c0_i32 = arith.constant 0 : i32
    %c0_i32_0 = arith.constant 0 : i32
    %c0_i32_1 = arith.constant 0 : i32
    return %c0_i32, %c0_i32_0 : i32, i32
  }
  func.func @transform_4(%arg0: i32) -> (i32, i32) {
    %c0_i32 = arith.constant 0 : i32
    %c0_i32_0 = arith.constant 0 : i32
    %c0_i32_1 = arith.constant 0 : i32
    return %c0_i32, %c0_i32_0 : i32, i32
  }
  func.func @transform_5(%arg0: i32) -> (i32, i32) {
    %c0_i32 = arith.constant 0 : i32
    %c0_i32_0 = arith.constant 0 : i32
    %c0_i32_1 = arith.constant 0 : i32
    return %c0_i32, %c0_i32_0 : i32, i32
  }
  func.func @transform_6(%arg0: i32) -> (i32, i32) {
    %c0_i32 = arith.constant 0 : i32
    %c0_i32_0 = arith.constant 0 : i32
    %c0_i32_1 = arith.constant 0 : i32
    return %c0_i32, %c0_i32_0 : i32, i32
  }
  func.func @transform_7(%arg0: i32) -> (i32, i32) {
    %c0_i32 = arith.constant 0 : i32
    %c0_i32_0 = arith.constant 0 : i32
    %c0_i32_1 = arith.constant 0 : i32
    return %c0_i32, %c0_i32_0 : i32, i32
  }
  func.func @transform_8(%arg0: i32) -> (i32, i32) {
    %c0_i32 = arith.constant 0 : i32
    %c0_i32_0 = arith.constant 0 : i32
    %c0_i32_1 = arith.constant 0 : i32
    return %c0_i32, %c0_i32_0 : i32, i32
  }
  func.func @transform_9(%arg0: i32) -> (i32, i32) {
    %c0_i32 = arith.constant 0 : i32
    %c0_i32_0 = arith.constant 0 : i32
    %c0_i32_1 = arith.constant 0 : i32
    return %c0_i32, %c0_i32_0 : i32, i32
  }
  func.func @transform_10(%arg0: i32) -> (i32, i32) {
    %c0_i32 = arith.constant 0 : i32
    %c0_i32_0 = arith.constant 0 : i32
    %c0_i32_1 = arith.constant 0 : i32
    return %c0_i32, %c0_i32_0 : i32, i32
  }
  func.func @transform_11(%arg0: i32) -> (i32, i32, i32) {
    %c0_i32 = arith.constant 0 : i32
    %c0_i32_0 = arith.constant 0 : i32
    %c0_i32_1 = arith.constant 0 : i32
    return %arg0, %c0_i32, %c0_i32_0 : i32, i32, i32
  }
}

</mosaic_0001>

<bundles_post_ra>
// kernel: tpu_custom_call.1
= control target key start
LH: loop header
LB: loop body
LE: loop exit
PB: predicated region body
PF: predicated region fallthrough
CT: control target
= control target key end

     0   :  { %s4738_s0 = inlined_call_operand.hbm [shape: f32[2,16,128], index: 0, kind: input, shape index: {}]   ;;  %s4739_s1 = inlined_call_operand.hbm [shape: bf16[3,128,512], index: 1, kind: input, shape index: {}]   ;;  %s4740_s2 = inlined_call_operand.vmem [shape: f32[1,512], index: 2, kind: input, shape index: {}]   ;;  %s4741_s3 = inlined_call_operand.hbm [shape: f32[9,512], index: 3, kind: input, shape index: {}]   ;;  %s4742_s4 = inlined_call_operand.vmem [shape: f32[1,512], index: 4, kind: input, shape index: {}]   ;;  %s4743_s5 = inlined_call_operand.vmem [shape: f32[2,32], index: 5, kind: input, shape index: {}]   ;;  %s4744_s6 = inlined_call_operand.vmem [shape: f32[2,1], index: 6, kind: input, shape index: {}]   ;;  %s4745_s7 = inlined_call_operand.vmem [shape: f32[2,32], index: 7, kind: input, shape index: {}]   ;;  %s4746_s8 = inlined_call_operand.vmem [shape: f32[1,32], index: 8, kind: input, shape index: {}]   ;;  %s4747_s9 = inlined_call_operand.hbm [shape: bf16[512,128], index: 9, kind: input, shape index: {}]   ;;  %s4748_s10 = inlined_call_operand.vmem [shape: f32[1,128], index: 10, kind: input, shape index: {}]   ;;  %s4749_s11 = inlined_call_operand.hbm [shape: f32[2,16,128], index: 11, kind: output, shape index: {}]  }
   0x1   :  { %4777 = sst [smem:[#allocation44_spill]] %s4739_s1 }
   0x2   :  { %4778 = sst [smem:[#allocation45_spill]] %s4741_s3 }
   0x3   :  { %4779 = sst [smem:[#allocation46_spill]] %s4747_s9 }
   0x4   :  { %16 = vsyncpa [#allocation5], 0 }
   0x5   :  { %18 = vsyncpa [#allocation5 + $0x1], 0 }
   0x6   :  { %19 = vsyncpa [#allocation8], 0 }
   0x7   :  { %20 = vsyncpa [#allocation11], 0 }
   0x8   :  { %21 = vsyncpa [#allocation6], 0 }
   0x9   :  { %23 = vsyncpa [#allocation6 + $0x1], 0  ;;  %s3810_s17 = smov 0   ;;  %s3812_s18 = smov 0  }
   0xa   :  { %s3814_s19 = smov 0   ;;  %s3816_s20 = smov 0  }
   0xb LB: > { %s3831_s21 = sadd.s32 4294967295, %s3728_s20   ;;  %s2989_s22 = sadd.s32 4294967294, %s3728_s20   ;;  %s3728_s20 = sphi %s3816_s20, %s4872_s20   ;;  %s3724_s19 = sphi %s3814_s19, %s4871_s19   ;;  %s3720_s18 = sphi %s3812_s18, %s4870_s18   ;;  %s3716_s17 = sphi %s3810_s17, %s4869_s17  }
   0xc   : > { %p49_p0 = scmp.ne.s32.totalorder %s3720_s18, %s3716_s17  ;;  %p4750_p1 = scmp.eq.s32.totalorder %s3831_s21, 0 }
   0xd   : > { %p289_p3 = scmp.eq.s32.totalorder %s2989_s22, 1  ;;  %p2990_p5 = scmp.ge.s32.totalorder %s3728_s20, 1 }
   0xe   : > { %p3840_p4 = por %p4750_p1, %p49_p0  ;;  %p296_p7 = scmp.lt.s32.totalorder %s3728_s20, 3 }
   0xf   : > { %p3845_p6 = por %p289_p3, %p49_p0  ;;  %s3730_s26 = smov [#allocation7]  }
  0x10   : > { %s4780_s23 = scalar_select %p3840_p4, 1, 0 }
  0x11   : > { %s4781_s24 = scalar_select %p3845_p6, 1, 0 }
  0x12   : > { %p3850_p8 = pnand %p2990_p5, %p296_p7  ;;  %s308_s27 = sshll.u32 %s3730_s26, 4  ;;  %s309_s27 = int_to_ptr.vmem [resolvable:$true] %s308_s27 }
  0x13   : > { %4782 = sst [smem:[#allocation17_spill]] %s4781_s24  ;;  %s3731_s29 = smov [#allocation9]  }
  0x14   : > { %s4783_s25 = scalar_select %p3850_p8, 1, 0 }
  0x15   : > { %p3222_p9 = pneg %p3850_p8  ;;  %s324_s30 = sshll.u32 %s3731_s29, 4  ;;  %s325_s30 = int_to_ptr.vmem [resolvable:$true] %s324_s30 }
  0x16   : > { %s3561_s12 = scalar_lea.vmem %s309_s27, 12288  ;;  %p3569_p5 = scmp.lt.s32.totalorder %s309_s27, %s309_s27 }
  0x17   : > { %p3859_p11 = pnand %p3222_p9, %p4750_p1  ;;  %p3562_p13 = scmp.ne.s32.totalorder %s309_s27, %s3561_s12 }
  0x18   : > { %p3570_p7 = scmp.lt.s32.totalorder %s3561_s12, %s3561_s12 }
  0x19   : > { %p3552_p12 = pneg %p3859_p11 }
  0x1a   : > { %p3571_p10 = por %p3570_p7, %p3569_p5 }
  0x1b   : > { %p3564_p0 = pnand %p3562_p13, %p3552_p12 }
  0x1d   : > { %p3565_p3 = pneg %p3564_p0 }
  0x1f   : > { %p3572_p9 = pnand %p3571_p10, %p3565_p3 }
  0x21   : > { %3575 = shalt.err (!%p3572_p9)
}
  0x22   : > { %s3732_s13 = smov 256   ;;  %s3733_s14 = smov 16  }
  0x23   : > { %s4785_s1 = sld [smem:[#allocation44_spill]]  ;;  %s3587_s22 = scalar_lea.vmem %s325_s30, 1024 }
  0x24   : > { %p3588_p1 = scmp.ne.s32.totalorder %s325_s30, %s3587_s22  ;;  %p3595_p2 = scmp.lt.s32.totalorder %s325_s30, %s325_s30 }
  0x25   : > { %p3596_p6 = scmp.lt.s32.totalorder %s3587_s22, %s3587_s22 }
  0x26   : > { %p3590_p13 = pnand %p3588_p1, %p3552_p12 }
  0x27   : > { %p3597_p5 = por %p3596_p6, %p3595_p2 }
  0x28   : > { %p3591_p0 = pneg %p3590_p13 }
  0x29   : > { %3225 = dma.hbm_to_vmem [thread:$0]  (!%p3859_p11), %s4785_s1, 12288, %s309_s27, [#allocation8], %s3732_s13, %s3732_s13, %s3733_s14  }
  0x2a   : > { %p3598_p10 = pnand %p3597_p5, %p3591_p0 }
  0x2c   : > { %3601 = shalt.err (!%p3598_p10)
}
  0x2d   : > { %s3734_s26 = smov 512   ;;  %s3735_s29 = smov 32  }
  0x2e   : > { %s4786_s3 = sld [smem:[#allocation45_spill]]  ;;  %s3736_s27 = smov [#allocation10]  }
  0x2f   : > { %s352_s13 = sshll.u32 %s3736_s27, 4  ;;  %s353_s13 = int_to_ptr.vmem [resolvable:$true] %s352_s13 }
  0x30   : > { %s3613_s14 = scalar_lea.vmem %s353_s13, 4096  ;;  %p3621_p6 = scmp.lt.s32.totalorder %s353_s13, %s353_s13 }
  0x31   : > { %p3614_p1 = scmp.ne.s32.totalorder %s353_s13, %s3613_s14  ;;  %p3622_p7 = scmp.lt.s32.totalorder %s3613_s14, %s3613_s14 }
  0x33   : > { %p3616_p3 = pnand %p3614_p1, %p3552_p12  ;;  %p3623_p9 = por %p3622_p7, %p3621_p6 }
  0x34   : > { %3228 = dma.hbm_to_vmem [thread:$0]  (!%p3859_p11), %s4786_s3, 1024, %s325_s30, [#allocation8], %s3734_s26, %s3734_s26, %s3735_s29  }
  0x35   : > { %p3617_p2 = pneg %p3616_p3 }
  0x37   : > { %p3624_p13 = pnand %p3623_p9, %p3617_p2 }
  0x39   : > { %3627 = shalt.err (!%p3624_p13)
}
  0x3a   : > { %s3737_s15 = smov 64   ;;  %s3738_s24 = smov 4  }
  0x3b   : > { %s4787_s9 = sld [smem:[#allocation46_spill]]  ;;  %s3890_s22 = sadd.s32 1, %s3728_s20  }
  0x3c   : > { %s33_s26 = ssub.s32 %s3728_s20, %s3890_s22  ;;  %s36_s29 = sadd.s32 1, %s3724_s19 }
  0x3d   : > { %p34_p12 = scmp.eq.s32.totalorder %s33_s26, 0  ;;  %p43_p0 = scmp.ne.s32.totalorder %s3724_s19, %s3720_s18 }
  0x3e   : > { %p44_p5 = scmp.eq.s32.totalorder %s3728_s20, 0  ;;  %p3243_p10 = scmp.lt.s32.totalorder %s3728_s20, 2 }
  0x3f   : > { %s3900_s12 = scalar_select %p34_p12, %s3724_s19, %s36_s29  }
  0x40   : > { %p45_p1 = por %p44_p5, %p43_p0  ;;  %p4789_p3 = scmp.eq.s32.totalorder %s3831_s21, 1 }
  0x41   : > { %3231 = dma.hbm_to_vmem [thread:$0]  (!%p3859_p11), %s4787_s9, 4096, %s353_s13, [#allocation11], %s3737_s15, %s3737_s15, %s3738_s24  }
  0x42   : > { %4788 = sst [smem:[#allocation18_spill]] %s3900_s12  ;;  %p3904_p2 = por %p4789_p3, %p43_p0 }
  0x43   : > { %s369_s28 = sand.u32 1, %s3724_s19   ;;  %s3160_s14 = sshll.u32 %s3728_s20, 8 }
  0x44   : > { %s4790_s27 = scalar_select %p3904_p2, 1, 0 }
  0x45   : > { %s2995_s13 = sshll.u32 %s369_s28, 4  ;;  %s3913_s30 = scalar_lea.hbm %s4738_s0, %s3160_s14 }
  0x46   : > { %s373_s16 = scalar_lea.vmem [#allocation4], %s2995_s13  ;;  %p3915_p11 = pnand %p3243_p10, %p45_p1 }
  0x47   : > { %s380_s26 = sshll.u32 %s373_s16, 4  ;;  %s3921_s1 = scalar_lea.sflag [#allocation5], %s369_s28  ;;  %s3919_s26 = int_to_ptr.vmem [resolvable:$true] %s380_s26 }
  0x48   : > { %s3628_s3 = scalar_lea.hbm %s3913_s30, 256  ;;  %p3630_p7 = pneg %p3915_p11 }
  0x49   : > { %p3629_p6 = scmp.ne.s32.totalorder %s3913_s30, %s3628_s3  ;;  %s3633_s13 = scalar_lea.hbm %s4738_s0, 512 }
  0x4a   : > { %p3634_p12 = scmp.lt.s32.totalorder %s3913_s30, %s4738_s0  ;;  %p3635_p0 = scmp.lt.s32.totalorder %s3633_s13, %s3628_s3 }
  0x4b   : > { %p3631_p9 = pnand %p3630_p7, %p3629_p6 }
  0x4c   : > { %p3636_p5 = por %p3635_p0, %p3634_p12 }
  0x4d   : > { %p3632_p13 = pneg %p3631_p9 }
  0x4f   : > { %p3637_p10 = pnand %p3636_p5, %p3632_p13 }
  0x51   : > { %3640 = shalt.err (!%p3637_p10)
}
  0x52   : > { %s3641_s28 = scalar_lea.vmem %s3919_s26, 256  ;;  %s3739_s9 = smov [#allocation4]  }
  0x53   : > { %p3642_p1 = scmp.ne.s32.totalorder %s3919_s26, %s3641_s28  ;;  %s3646_s12 = sshll.u32 %s3739_s9, 4  ;;  %s3647_s12 = int_to_ptr.vmem [resolvable:$false] %s3646_s12 }
  0x54   : > { %s3648_s14 = scalar_lea.vmem %s3647_s12, 512  ;;  %p3649_p9 = scmp.lt.s32.totalorder %s3919_s26, %s3647_s12 }
  0x55   : > { %p3644_p3 = pnand %p3642_p1, %p3630_p7  ;;  %p3650_p2 = scmp.lt.s32.totalorder %s3648_s14, %s3641_s28 }
  0x57   : > { %p3645_p6 = pneg %p3644_p3  ;;  %p3651_p4 = por %p3650_p2, %p3649_p9 }
  0x59   : > { %p3652_p8 = pnand %p3651_p4, %p3645_p6 }
  0x5b   : > { %3655 = shalt.err (!%p3652_p8)
}
  0x5c   : > { %s3740_s3 = smov 128   ;;  %s3741_s15 = smov 8  }
  0x5d   : > { %3235 = dma.hbm_to_vmem [thread:$0]  (!%p3915_p11), %s3913_s30, 256, %s3919_s26, %s3921_s1, %s3740_s3, %s3740_s3, %s3741_s15  }
  0x5e   : > { %p4792_p7 = scmp.ne.s32.totalorder %s4783_s25, 0 }
  0x60   : > { %392 = sbr.rel (%p4792_p7) target bundleno = 1641 (0x669), region = 64 }
  0x65   : > { %s3945_s9 = sand.u32 1, %s3720_s18   ;;  %p4793_p4 = scmp.ne.s32.totalorder %s4780_s23, 0 }
  0x66   : > { %s2999_s12 = sshll.u32 %s3945_s9, 4  ;;  %s395_s13 = scalar_lea.sflag [#allocation5], %s3945_s9 }
  0x67   : > { %s3951_s24 = scalar_lea.vmem [#allocation4], %s2999_s12 }
  0x68   : > { %3699 = dma.done.wait (%p4793_p4), %s395_s13, 256  }
  0x69   : > { %3701 = vsyncadd (%p4793_p4), %s395_s13, 4294967040  ;;  %p4794_p8 = scmp.eq.s32.totalorder %s3831_s21, 0 }
  0x6b   : > { %3703 = dma.done.wait (%p4794_p8), [#allocation8], 13312   ;;  %p4795_p2 = pmov %p4794_p8 }
  0x6d   : > { %3705 = vsyncadd (%p4795_p2), [#allocation8], 4294953984  ;;  %p4796_p11 = pmov %p4795_p2 }
  0x6e   : > { %p4797_p13 = pmov %p4795_p2 }
  0x6f   : > { %3707 = dma.done.wait (%p4796_p11), [#allocation11], 4096  }
  0x70   : > { %3709 = vsyncadd (%p4797_p13), [#allocation11], 4294963200  ;;  %v3742_v0 = vmov 0   ;;  %v3743_v1 = vmov 0.0   ;;  %v3300_v2 = vld [vmem:[#allocation7 + $0x1e4] ss:$16 sps:$4 sm:$0xff]  }
  0x71   : > { %719 = vmatprep.mubr.bf16.mxu0 %v3742_v0  ;;  %762 = vmatprep.mubr.bf16.mxu1 %v3742_v0  ;;  %452 = vst [vmem:[#allocation2] sm:$0x1] %v3743_v1  ;;  %453 = vst [vmem:[#allocation2 + $0x11] sm:$0x1] %v3743_v1  ;;  %v3302_v3 = vld [vmem:[#allocation7 + $0x1ec] ss:$16 sps:$4 sm:$0xff]  }
  0x72   : > { %3298 = vset.pattern.permute.xlu1 %v3742_v0  ;;  %3299 = vset.pattern.permute.xlu0 %v3742_v0  ;;  %v3304_v4 = vld [vmem:[#allocation7 + $0x1e0] ss:$16 sps:$4 sm:$0xff]   ;;  %v3305_v5 = vld [vmem:[#allocation7 + $0x1e8] ss:$16 sps:$4 sm:$0xff]   ;;  %v3306_v6 = vld [vmem:[#allocation7 + $0x1c4] ss:$16 sps:$4 sm:$0xff]  }
  0x73   : > { %687 = vmatprep.subr.bf16.mxu0 %v3300_v2  ;;  %730 = vmatprep.subr.bf16.mxu1 %v3302_v3  ;;  %v3308_v7 = vld [vmem:[#allocation7 + $0x1cc] ss:$16 sps:$4 sm:$0xff]   ;;  %v3310_v8 = vld [vmem:[#allocation7 + $0x1c0] ss:$16 sps:$4 sm:$0xff]   ;;  %v3311_v9 = vld [vmem:[#allocation7 + $0x1c8] ss:$16 sps:$4 sm:$0xff]  }
  0x74   : > { %688 = vmatpush1.bf16.msra.mxu0 %v3304_v4  ;;  %731 = vmatpush1.bf16.msra.mxu1 %v3305_v5  ;;  %v3312_v10 = vld [vmem:[#allocation7 + $0x1a4] ss:$16 sps:$4 sm:$0xff]   ;;  %v3314_v11 = vld [vmem:[#allocation7 + $0x1ac] ss:$16 sps:$4 sm:$0xff]   ;;  %v3316_v12 = vld [vmem:[#allocation7 + $0x1a0] ss:$16 sps:$4 sm:$0xff]  }
  0x75   : > { %689 = vmatprep.subr.bf16.mxu0 %v3306_v6  ;;  %732 = vmatprep.subr.bf16.mxu1 %v3308_v7  ;;  %v3317_v13 = vld [vmem:[#allocation7 + $0x1a8] ss:$16 sps:$4 sm:$0xff]   ;;  %v3318_v14 = vld [vmem:[#allocation7 + $0x184] ss:$16 sps:$4 sm:$0xff]   ;;  %v3320_v15 = vld [vmem:[#allocation7 + $0x18c] ss:$16 sps:$4 sm:$0xff]  }
  0x76   : > { %v3322_v16 = vld [vmem:[#allocation7 + $0x180] ss:$16 sps:$4 sm:$0xff]   ;;  %v3323_v17 = vld [vmem:[#allocation7 + $0x188] ss:$16 sps:$4 sm:$0xff]   ;;  %v3324_v18 = vld [vmem:[#allocation7 + $0x164] ss:$16 sps:$4 sm:$0xff]  }
  0x77   : > { %v3326_v19 = vld [vmem:[#allocation7 + $0x16c] ss:$16 sps:$4 sm:$0xff]   ;;  %v3328_v20 = vld [vmem:[#allocation7 + $0x160] ss:$16 sps:$4 sm:$0xff]   ;;  %v3329_v21 = vld [vmem:[#allocation7 + $0x168] ss:$16 sps:$4 sm:$0xff]  }
  0x78   : > { %690 = vmatpush1.bf16.msra.mxu0 %v3310_v8  ;;  %733 = vmatpush1.bf16.msra.mxu1 %v3311_v9  ;;  %v3330_v22 = vld [vmem:[#allocation7 + $0x144] ss:$16 sps:$4 sm:$0xff]   ;;  %v3332_v23 = vld [vmem:[#allocation7 + $0x14c] ss:$16 sps:$4 sm:$0xff]   ;;  %v3334_v24 = vld [vmem:[#allocation7 + $0x140] ss:$16 sps:$4 sm:$0xff]  }
  0x79   : > { %691 = vmatprep.subr.bf16.mxu0 %v3312_v10  ;;  %734 = vmatprep.subr.bf16.mxu1 %v3314_v11  ;;  %v3335_v25 = vld [vmem:[#allocation7 + $0x148] ss:$16 sps:$4 sm:$0xff]   ;;  %v3336_v26 = vld [vmem:[#allocation7 + $0x124] ss:$16 sps:$4 sm:$0xff]   ;;  %v3338_v27 = vld [vmem:[#allocation7 + $0x12c] ss:$16 sps:$4 sm:$0xff]  }
  0x7a   : > { %v450_v28 = vld [vmem:[%s3951_s24] sm:$0xff]  ;;  %v451_v29 = vld [vmem:[%s3951_s24 + $0x8] sm:$0xff]  ;;  %s3744_s25 = smov 96   ;;  %s3745_s30 = smov 32   ;;  %vm1511_vm1 = vcmask 1042432   ;;  %vm1693_vm2 = vcmask 1045504  }
  0x7b   : > { %454 = vst [vmem:[#allocation2 + $0x1] sm:$0xff] %v450_v28  ;;  %455 = vst [vmem:[#allocation2 + $0x9] sm:$0xff] %v451_v29  ;;  %v3340_v30 = vld [vmem:[#allocation7 + $0x120] ss:$16 sps:$4 sm:$0xff]   ;;  %v3341_v31 = vld [vmem:[#allocation7 + $0x128] ss:$16 sps:$4 sm:$0xff]   ;;  %v493_v38 = vpack.c.bf16 %v451_v29, %v450_v28 }
  0x7c   : > { %692 = vmatpush1.bf16.msra.mxu0 %v3316_v12  ;;  %735 = vmatpush1.bf16.msra.mxu1 %v3317_v13  ;;  %v3342_v32 = vld [vmem:[#allocation7 + $0x104] ss:$16 sps:$4 sm:$0xff]   ;;  %v3344_v33 = vld [vmem:[#allocation7 + $0x10c] ss:$16 sps:$4 sm:$0xff]   ;;  %v3346_v34 = vld [vmem:[#allocation7 + $0x100] ss:$16 sps:$4 sm:$0xff]  }
  0x7d   : > { %693 = vmatprep.subr.bf16.mxu0 %v3318_v14  ;;  %736 = vmatprep.subr.bf16.mxu1 %v3320_v15  ;;  %v3347_v35 = vld [vmem:[#allocation7 + $0x108] ss:$16 sps:$4 sm:$0xff]   ;;  %v3350_v36 = vld [vmem:[#allocation7 + $0xe4] ss:$16 sps:$4 sm:$0xff]   ;;  %v3353_v37 = vld [vmem:[#allocation7 + $0xec] ss:$16 sps:$4 sm:$0xff]  }
  0x7e   : > { %v3348_v39 = vld [vmem:[#allocation7 + $0xe0] ss:$16 sps:$4 sm:$0xff]   ;;  %v3351_v40 = vld [vmem:[#allocation7 + $0xe8] ss:$16 sps:$4 sm:$0xff]   ;;  %v3356_v41 = vld [vmem:[#allocation7 + $0xc4] ss:$16 sps:$4 sm:$0xff]  }
  0x7f   : > { %v3359_v42 = vld [vmem:[#allocation7 + $0xcc] ss:$16 sps:$4 sm:$0xff]   ;;  %v3354_v43 = vld [vmem:[#allocation7 + $0xc0] ss:$16 sps:$4 sm:$0xff]   ;;  %v3357_v44 = vld [vmem:[#allocation7 + $0xc8] ss:$16 sps:$4 sm:$0xff]  }
  0x80   : > { %694 = vmatpush1.bf16.msra.mxu0 %v3322_v16  ;;  %737 = vmatpush1.bf16.msra.mxu1 %v3323_v17  ;;  %v3362_v45 = vld [vmem:[#allocation7 + $0xa4] ss:$16 sps:$4 sm:$0xff]   ;;  %v3365_v46 = vld [vmem:[#allocation7 + $0xac] ss:$16 sps:$4 sm:$0xff]   ;;  %v3360_v47 = vld [vmem:[#allocation7 + $0xa0] ss:$16 sps:$4 sm:$0xff]  }
  0x81   : > { %695 = vmatprep.subr.bf16.mxu0 %v3324_v18  ;;  %738 = vmatprep.subr.bf16.mxu1 %v3326_v19  ;;  %v3363_v48 = vld [vmem:[#allocation7 + $0xa8] ss:$16 sps:$4 sm:$0xff]   ;;  %v3368_v49 = vld [vmem:[#allocation7 + $0x84] ss:$16 sps:$4 sm:$0xff]   ;;  %v3371_v50 = vld [vmem:[#allocation7 + $0x8c] ss:$16 sps:$4 sm:$0xff]  }
  0x82   : > { %v3366_v51 = vld [vmem:[#allocation7 + $0x80] ss:$16 sps:$4 sm:$0xff]   ;;  %v3369_v52 = vld [vmem:[#allocation7 + $0x88] ss:$16 sps:$4 sm:$0xff]   ;;  %v3374_v53 = vld [vmem:[#allocation7 + $0x64] ss:$16 sps:$4 sm:$0xff]  }
  0x83   : > { %v3377_v54 = vld [vmem:[#allocation7 + $0x6c] ss:$16 sps:$4 sm:$0xff]   ;;  %v3372_v55 = vld [vmem:[#allocation7 + $0x60] ss:$16 sps:$4 sm:$0xff]   ;;  %v3375_v56 = vld [vmem:[#allocation7 + $0x68] ss:$16 sps:$4 sm:$0xff]  }
  0x84   : > { %696 = vmatpush1.bf16.msra.mxu0 %v3328_v20  ;;  %739 = vmatpush1.bf16.msra.mxu1 %v3329_v21  ;;  %v3380_v57 = vld [vmem:[#allocation7 + $0x44] ss:$16 sps:$4 sm:$0xff]   ;;  %v3383_v58 = vld [vmem:[#allocation7 + $0x4c] ss:$16 sps:$4 sm:$0xff]   ;;  %v3378_v59 = vld [vmem:[#allocation7 + $0x40] ss:$16 sps:$4 sm:$0xff]  }
  0x85   : > { %697 = vmatprep.subr.bf16.mxu0 %v3330_v22  ;;  %740 = vmatprep.subr.bf16.mxu1 %v3332_v23  ;;  %v3381_v60 = vld [vmem:[#allocation7 + $0x48] ss:$16 sps:$4 sm:$0xff]   ;;  %v3386_v61 = vld [vmem:[#allocation7 + $0x24] ss:$16 sps:$4 sm:$0xff]   ;;  %v3389_v62 = vld [vmem:[#allocation7 + $0x2c] ss:$16 sps:$4 sm:$0xff]  }
  0x86   : > { %v3384_v63 = vld [vmem:[#allocation7 + $0x20] ss:$16 sps:$4 sm:$0xff]   ;;  %v3387_v2 = vld [vmem:[#allocation7 + $0x28] ss:$16 sps:$4 sm:$0xff]   ;;  %v3392_v3 = vld [vmem:[#allocation7 + $0x4] ss:$16 sps:$4 sm:$0xff]  }
  0x87   : > { %v3395_v4 = vld [vmem:[#allocation7 + $0xc] ss:$16 sps:$4 sm:$0xff]   ;;  %v3390_v5 = vld [vmem:[#allocation7] ss:$16 sps:$4 sm:$0xff]   ;;  %v3393_v6 = vld [vmem:[#allocation7 + $0x8] ss:$16 sps:$4 sm:$0xff]  }
  0x88   : > { %698 = vmatpush1.bf16.msra.mxu0 %v3334_v24  ;;  %741 = vmatpush1.bf16.msra.mxu1 %v3335_v25  ;;  %v456_v7 = vld [vmem:[#allocation2] sm:$0xff]  ;;  %v457_v8 = vld [vmem:[#allocation2 + $0x8] sm:$0xff]  ;;  %vm1556_vm3 = vcmask 1044480   ;;  %vm1419_vm4 = vcmask 261120   ;;  %vm1446_vm5 = vcmask 785408   ;;  %vm1782_vm6 = vcmask 1043456  }
  0x89   : > { %699 = vmatprep.subr.bf16.mxu0 %v3336_v26  ;;  %742 = vmatprep.subr.bf16.mxu1 %v3338_v27  ;;  %v3398_v9 = vld [vmem:[#allocation7 + $0x2e4] ss:$16 sps:$4 sm:$0xff]   ;;  %v3401_v10 = vld [vmem:[#allocation7 + $0x2ec] ss:$16 sps:$4 sm:$0xff]   ;;  %v458_v11 = vpack.c.bf16 %v457_v8, %v456_v7  ;;  %v3396_v12 = vld [vmem:[#allocation7 + $0x2e0] ss:$16 sps:$4 sm:$0xff]  }
  0x8a   : > { %v3399_v13 = vld [vmem:[#allocation7 + $0x2e8] ss:$16 sps:$4 sm:$0xff]   ;;  %v3404_v14 = vld [vmem:[#allocation7 + $0x2c4] ss:$16 sps:$4 sm:$0xff]   ;;  %v3407_v15 = vld [vmem:[#allocation7 + $0x2cc] ss:$16 sps:$4 sm:$0xff]  }
  0x8b   : > { %v3402_v16 = vld [vmem:[#allocation7 + $0x2c0] ss:$16 sps:$4 sm:$0xff]   ;;  %v3405_v17 = vld [vmem:[#allocation7 + $0x2c8] ss:$16 sps:$4 sm:$0xff]   ;;  %v3410_v18 = vld [vmem:[#allocation7 + $0x2a4] ss:$16 sps:$4 sm:$0xff]  }
  0x8c   : > { %700 = vmatpush1.bf16.msra.mxu0 %v3340_v30  ;;  %743 = vmatpush1.bf16.msra.mxu1 %v3341_v31  ;;  %v3413_v19 = vld [vmem:[#allocation7 + $0x2ac] ss:$16 sps:$4 sm:$0xff]   ;;  %v3408_v20 = vld [vmem:[#allocation7 + $0x2a0] ss:$16 sps:$4 sm:$0xff]   ;;  %v3411_v21 = vld [vmem:[#allocation7 + $0x2a8] ss:$16 sps:$4 sm:$0xff]  }
  0x8d   : > { %701 = vmatprep.subr.bf16.mxu0 %v3342_v32  ;;  %744 = vmatprep.subr.bf16.mxu1 %v3344_v33  ;;  %v3416_v22 = vld [vmem:[#allocation7 + $0x284] ss:$16 sps:$4 sm:$0xff]   ;;  %v3419_v23 = vld [vmem:[#allocation7 + $0x28c] ss:$16 sps:$4 sm:$0xff]   ;;  %v3414_v24 = vld [vmem:[#allocation7 + $0x280] ss:$16 sps:$4 sm:$0xff]  }
  0x8e   : > { %v3417_v25 = vld [vmem:[#allocation7 + $0x288] ss:$16 sps:$4 sm:$0xff]   ;;  %v3422_v26 = vld [vmem:[#allocation7 + $0x264] ss:$16 sps:$4 sm:$0xff]   ;;  %v3425_v27 = vld [vmem:[#allocation7 + $0x26c] ss:$16 sps:$4 sm:$0xff]  }
  0x8f   : > { %v3420_v28 = vld [vmem:[#allocation7 + $0x260] ss:$16 sps:$4 sm:$0xff]   ;;  %v3423_v29 = vld [vmem:[#allocation7 + $0x268] ss:$16 sps:$4 sm:$0xff]   ;;  %v3428_v30 = vld [vmem:[#allocation7 + $0x244] ss:$16 sps:$4 sm:$0xff]  }
  0x90   : > { %702 = vmatpush1.bf16.msra.mxu0 %v3346_v34  ;;  %745 = vmatpush1.bf16.msra.mxu1 %v3347_v35  ;;  %v3431_v31 = vld [vmem:[#allocation7 + $0x24c] ss:$16 sps:$4 sm:$0xff]   ;;  %v3429_v32 = vld [vmem:[#allocation7 + $0x248] ss:$16 sps:$4 sm:$0xff]   ;;  %v3434_v33 = vld [vmem:[#allocation7 + $0x224] ss:$16 sps:$4 sm:$0xff]  }
  0x91   : > { %933 = vmatprep.subr.bf16.mxu0 %v3350_v36  ;;  %976 = vmatprep.subr.bf16.mxu1 %v3353_v37  ;;  %v3437_v34 = vld [vmem:[#allocation7 + $0x22c] ss:$16 sps:$4 sm:$0xff]   ;;  %v3432_v35 = vld [vmem:[#allocation7 + $0x220] ss:$16 sps:$4 sm:$0xff]   ;;  %v3435_v36 = vld [vmem:[#allocation7 + $0x228] ss:$16 sps:$4 sm:$0xff]  }
  0x92   : > { %v3440_v37 = vld [vmem:[#allocation7 + $0x204] ss:$16 sps:$4 sm:$0xff]   ;;  %vm1468_vm7 = vcmask 1040384   ;;  %vm1867_vm8 = vcmask 1046528   ;;  %vm2288_vm9 = vcmask 1041408   ;;  %s3746_s16 = smov 64  }
  0x93   : > { %720 = vmatmul.mubr.bf16.vlgmr.msra.gmra.mxu0 %v493_v38  ;;  %763 = vmatmul.mubr.bf16.vlgmr.msra.gmra.mxu1 %v493_v38  ;;  %v3443_v38 = vld [vmem:[#allocation7 + $0x20c] ss:$16 sps:$4 sm:$0xff]   ;;  %vm2459_vm10 = vcmask 254976   ;;  %vm2505_vm11 = vcmask 523264   ;;  %s448_s26 = scalar_lea.vmem [#allocation12], %s2999_s12  ;;  %s2874_s12 = scalar_lea.sflag [#allocation6], %s3945_s9 }
  0x94   : > { %934 = vmatpush1.bf16.msra.mxu0 %v3348_v39  ;;  %977 = vmatpush1.bf16.msra.mxu1 %v3351_v40  ;;  %v3438_v39 = vld [vmem:[#allocation7 + $0x200] ss:$16 sps:$4 sm:$0xff]   ;;  %v3441_v40 = vld [vmem:[#allocation7 + $0x208] ss:$16 sps:$4 sm:$0xff]   ;;  %s2887_s29 = sshll.u32 %s448_s26, 4  ;;  %p4864_p0 = scmp.ne.s32.totalorder %s4790_s27, 0  ;;  %s4690_s29 = int_to_ptr.vmem [resolvable:$true] %s2887_s29 }
  0x95   : > { %935 = vmatprep.subr.bf16.mxu0 %v3356_v41  ;;  %978 = vmatprep.subr.bf16.mxu1 %v3359_v42  ;;  %v1019_v41 = vld [vmem:[#allocation2 + $0x2] sm:$0xff]  ;;  %v1020_v42 = vld [vmem:[#allocation2 + $0xa] sm:$0xff]  ;;  %s3656_s15 = scalar_lea.vmem %s4690_s29, 256 }
  0x96   : > { %965 = vmatprep.mubr.bf16.mxu0 %v3742_v0  ;;  %1008 = vmatprep.mubr.bf16.mxu1 %v3742_v0  ;;  %p3657_p12 = scmp.ne.s32.totalorder %s4690_s29, %s3656_s15 }
  0x98   : > { %936 = vmatpush1.bf16.msra.mxu0 %v3354_v43  ;;  %979 = vmatpush1.bf16.msra.mxu1 %v3357_v44  ;;  %v1021_v43 = vpack.c.bf16 %v1020_v42, %v1019_v41  ;;  %v1311_v44 = vlaneseq  ;;  %p3658_p5 = pnand %p3657_p12, %p4864_p0 }
  0x99   : > { %937 = vmatprep.subr.bf16.mxu0 %v3362_v45  ;;  %980 = vmatprep.subr.bf16.mxu1 %v3365_v46 }
  0x9a   : > { %vm1459_vm0 = vcmp.lt.s32.totalorder %v1311_v44, 512  ;;  %p3659_p10 = pneg %p3658_p5 }
  0x9b   : > { %1461 = vst.msk [vmem:[#allocation3] ss:$8 sm:$0xf] %vm1459_vm0, %v3743_v1  ;;  %1464 = vst.msk [vmem:[#allocation3 + $0x41] ss:$8 sm:$0xf] %vm1459_vm0, %v3743_v1 }
  0x9c   : > { %938 = vmatpush1.bf16.msra.mxu0 %v3360_v47  ;;  %981 = vmatpush1.bf16.msra.mxu1 %v3363_v48  ;;  %1506 = vst.msk [vmem:[#allocation3 + $0x42] ss:$8 sm:$0xf] %vm1459_vm0, %v3743_v1  ;;  %1509 = vst.msk [vmem:[#allocation3 + $0x83] ss:$8 sm:$0xf] %vm1459_vm0, %v3743_v1 }
  0x9d   : > { %939 = vmatprep.subr.bf16.mxu0 %v3368_v49  ;;  %982 = vmatprep.subr.bf16.mxu1 %v3371_v50  ;;  %1549 = vst.msk [vmem:[#allocation3 + $0x84] ss:$8 sm:$0xf] %vm1459_vm0, %v3743_v1  ;;  %1552 = vst.msk [vmem:[#allocation3 + $0xc5] ss:$8 sm:$0xf] %vm1459_vm0, %v3743_v1 }
  0xa0   : > { %940 = vmatpush1.bf16.msra.mxu0 %v3366_v51  ;;  %983 = vmatpush1.bf16.msra.mxu1 %v3369_v52 }
  0xa1   : > { %941 = vmatprep.subr.bf16.mxu0 %v3374_v53  ;;  %984 = vmatprep.subr.bf16.mxu1 %v3377_v54 }
  0xa4   : > { %942 = vmatpush1.bf16.msra.mxu0 %v3372_v55  ;;  %985 = vmatpush1.bf16.msra.mxu1 %v3375_v56 }
  0xa5   : > { %943 = vmatprep.subr.bf16.mxu0 %v3380_v57  ;;  %986 = vmatprep.subr.bf16.mxu1 %v3383_v58  ;;  %v3983_v57 = vshrl.u32 %v1311_v44, 7 }
  0xa7   : > { %v3989_v1 = vsub.s32 2, %v3983_v57 }
  0xa8   : > { %944 = vmatpush1.bf16.msra.mxu0 %v3378_v59  ;;  %987 = vmatpush1.bf16.msra.mxu1 %v3381_v60  ;;  %v3986_v60 = vsub.s32 0, %v3983_v57 }
  0xa9   : > { %945 = vmatprep.subr.bf16.mxu0 %v3386_v61  ;;  %988 = vmatprep.subr.bf16.mxu1 %v3389_v62  ;;  %v1309_v61 = vld [vmem:[%s4740_s2] sm:$0xf]  ;;  %v3995_v62 = vsub.s32 1, %v3983_v57 }
  0xaa   : > { %4798 = vst [vmem:[#allocation19_spill] sm:$0xff] %v3986_v60  ;;  %v1322_v7 = vrot.slane %v1309_v61, %v3989_v1 }
  0xac   : > { %946 = vmatpush1.bf16.msra.mxu0 %v3384_v63  ;;  %989 = vmatpush1.bf16.msra.mxu1 %v3387_v2  ;;  %v3998_v63 = vsub.s32 3, %v3983_v57 }
  0xad   : > { %947 = vmatprep.subr.bf16.mxu0 %v3392_v3  ;;  %990 = vmatprep.subr.bf16.mxu1 %v3395_v4 }
  0xb0   : > { %948 = vmatpush1.bf16.msra.mxu0 %v3390_v5  ;;  %991 = vmatpush1.bf16.msra.mxu1 %v3393_v6  ;;  %v1314_v6 = vrot.slane %v1309_v61, %v3986_v60 }
  0xb1   : > { %1215 = vmatprep.subr.bf16.mxu0 %v3398_v9  ;;  %1258 = vmatprep.subr.bf16.mxu1 %v3401_v10  ;;  %v1318_v10 = vrot.slane %v1309_v61, %v3995_v62 }
  0xb3   : > { %966 = vmatmul.mubr.bf16.vlgmr.msra.gmra.mxu0 %v458_v11  ;;  %1009 = vmatmul.mubr.bf16.vlgmr.msra.gmra.mxu1 %v458_v11  ;;  %v1326_v11 = vrot.slane %v1309_v61, %v3998_v63 }
  0xb4   : > { %1216 = vmatpush1.bf16.msra.mxu0 %v3396_v12  ;;  %1259 = vmatpush1.bf16.msra.mxu1 %v3399_v13 }
  0xb5   : > { %1217 = vmatprep.subr.bf16.mxu0 %v3404_v14  ;;  %1260 = vmatprep.subr.bf16.mxu1 %v3407_v15 }
  0xb6   : > { %1247 = vmatprep.mubr.bf16.mxu0 %v3742_v0  ;;  %1290 = vmatprep.mubr.bf16.mxu1 %v3742_v0  ;;  %v3426_v0 = vld [vmem:[#allocation7 + $0x240] ss:$16 sps:$4 sm:$0xff]  }
  0xb8   : > { %1218 = vmatpush1.bf16.msra.mxu0 %v3402_v16  ;;  %1261 = vmatpush1.bf16.msra.mxu1 %v3405_v17 }
  0xb9   : > { %1219 = vmatprep.subr.bf16.mxu0 %v3410_v18  ;;  %1262 = vmatprep.subr.bf16.mxu1 %v3413_v19 }
  0xbc   : > { %1220 = vmatpush1.bf16.msra.mxu0 %v3408_v20  ;;  %1263 = vmatpush1.bf16.msra.mxu1 %v3411_v21 }
  0xbd   : > { %1221 = vmatprep.subr.bf16.mxu0 %v3416_v22  ;;  %1264 = vmatprep.subr.bf16.mxu1 %v3419_v23 }
  0xc0   : > { %1222 = vmatpush1.bf16.msra.mxu0 %v3414_v24  ;;  %1265 = vmatpush1.bf16.msra.mxu1 %v3417_v25 }
  0xc1   : > { %1223 = vmatprep.subr.bf16.mxu0 %v3422_v26  ;;  %1266 = vmatprep.subr.bf16.mxu1 %v3425_v27 }
  0xc4   : > { %1224 = vmatpush1.bf16.msra.mxu0 %v3420_v28  ;;  %1267 = vmatpush1.bf16.msra.mxu1 %v3423_v29 }
  0xc5   : > { %1225 = vmatprep.subr.bf16.mxu0 %v3428_v30  ;;  %1268 = vmatprep.subr.bf16.mxu1 %v3431_v31 }
  0xc8   : > { %1226 = vmatpush1.bf16.msra.mxu0 %v3426_v0  ;;  %1269 = vmatpush1.bf16.msra.mxu1 %v3429_v32 }
  0xc9   : > { %1227 = vmatprep.subr.bf16.mxu0 %v3434_v33  ;;  %1270 = vmatprep.subr.bf16.mxu1 %v3437_v34 }
  0xcc   : > { %1228 = vmatpush1.bf16.msra.mxu0 %v3432_v35  ;;  %1271 = vmatpush1.bf16.msra.mxu1 %v3435_v36 }
  0xcd   : > { %1229 = vmatprep.subr.bf16.mxu0 %v3440_v37  ;;  %1272 = vmatprep.subr.bf16.mxu1 %v3443_v38 }
  0xd0   : > { %1230 = vmatpush1.bf16.msra.mxu0 %v3438_v39  ;;  %1273 = vmatpush1.bf16.msra.mxu1 %v3441_v40 }
  0xd3   : > { %1248 = vmatmul.mubr.bf16.vlgmr.msra.gmra.mxu0 %v1021_v43  ;;  %1291 = vmatmul.mubr.bf16.vlgmr.msra.gmra.mxu1 %v1021_v43 }
 0x153   : > { %v721_v45 = vpop.f32.mrf.mxu0  ;;  %v764_v46 = vpop.f32.mrf.mxu1 }
 0x155   : > { %v723_v47 = vpop.f32.mrf.mxu0  ;;  %v766_v48 = vpop.f32.mrf.mxu1 }
 0x157   : > { %v725_v49 = vpop.f32.mrf.mxu0  ;;  %v768_v50 = vpop.f32.mrf.mxu1 }
 0x159   : > { %v727_v51 = vpop.f32.mrf.mxu0  ;;  %v770_v52 = vpop.f32.mrf.mxu1 }
 0x173   : > { %v967_v53 = vpop.f32.mrf.mxu0  ;;  %v1010_v54 = vpop.f32.mrf.mxu1 }
 0x174   : > { %v968_v4 = vadd.f32 %v967_v53, %v721_v45  ;;  %v1011_v5 = vadd.f32 %v1010_v54, %v764_v46 }
 0x175   : > { %v969_v55 = vpop.f32.mrf.mxu0  ;;  %v1012_v56 = vpop.f32.mrf.mxu1 }
 0x176   : > { %v970_v12 = vadd.f32 %v969_v55, %v723_v47  ;;  %v1013_v13 = vadd.f32 %v1012_v56, %v766_v48 }
 0x177   : > { %v971_v58 = vpop.f32.mrf.mxu0  ;;  %v1014_v59 = vpop.f32.mrf.mxu1 }
 0x178   : > { %v972_v22 = vadd.f32 %v971_v58, %v725_v49  ;;  %v1015_v23 = vadd.f32 %v1014_v59, %v768_v50 }
 0x179   : > { %v973_v2 = vpop.f32.mrf.mxu0  ;;  %v1016_v3 = vpop.f32.mrf.mxu1 }
 0x17a   : > { %v974_v24 = vadd.f32 %v973_v2, %v727_v51  ;;  %v1017_v31 = vadd.f32 %v1016_v3, %v770_v52 }
 0x193   : > { %v1249_v8 = vpop.f32.mrf.mxu0  ;;  %v1292_v9 = vpop.f32.mrf.mxu1 }
 0x194   : > { %v1301_v14 = vadd.f32 %v1249_v8, %v968_v4  ;;  %v1303_v15 = vadd.f32 %v1292_v9, %v1011_v5 }
 0x195   : > { %v1251_v16 = vpop.f32.mrf.mxu0  ;;  %v1294_v17 = vpop.f32.mrf.mxu1 }
 0x196   : > { %v4004_v18 = vadd.f32 %v1314_v6, %v1301_v14  ;;  %v4006_v19 = vadd.f32 %v1322_v7, %v1303_v15  ;;  %v1302_v20 = vadd.f32 %v1251_v16, %v970_v12  ;;  %v1304_v21 = vadd.f32 %v1294_v17, %v1013_v13 }
 0x197   : > { %v1253_v25 = vpop.f32.mrf.mxu0  ;;  %v1296_v26 = vpop.f32.mrf.mxu1 }
 0x198   : > { %v3100_v27 = vmul.f32 -1.442695, %v4004_v18  ;;  %v3102_v28 = vmul.f32 -1.442695, %v4006_v19  ;;  %v1332_v29 = vadd.f32 %v1318_v10, %v1302_v20  ;;  %v1334_v30 = vadd.f32 %v1326_v11, %v1304_v21 }
 0x199   : > { %v1305_v0 = vadd.f32 %v1253_v25, %v972_v22  ;;  %v1307_v32 = vadd.f32 %v1296_v26, %v1015_v23  ;;  %v1255_v33 = vpop.f32.mrf.mxu0  ;;  %v1298_v34 = vpop.f32.mrf.mxu1 }
 0x19a   : > { %3476 = vpow2.f32 %v3100_v27  ;;  %v3101_v35 = vmul.f32 -1.442695, %v1332_v29  ;;  %v3103_v36 = vmul.f32 -1.442695, %v1334_v30  ;;  %v1306_v37 = vadd.f32 %v1255_v33, %v974_v24  ;;  %v4050_v33 = vld [vmem:[#allocation9 + $0x8] sm:$0xff] }
 0x19b   : > { %3478 = vpow2.f32 %v3102_v28  ;;  %v1335_v38 = vadd.f32 %v1314_v6, %v1305_v0  ;;  %v4010_v39 = vadd.f32 %v1322_v7, %v1307_v32  ;;  %v1308_v40 = vadd.f32 %v1298_v34, %v1017_v31  ;;  %v4048_v32 = vld [vmem:[#allocation9] sm:$0xff]  ;;  %v4052_v34 = vld [vmem:[#allocation9 + $0x10] sm:$0xff] }
 0x19c   : > { %3480 = vpow2.f32 %v3101_v35  ;;  %v4012_v41 = vadd.f32 %v1318_v10, %v1306_v37  ;;  %v4054_v35 = vld [vmem:[#allocation9 + $0x18] sm:$0xff]  ;;  %v2166_v37 = vsub.s32 7, %v3983_v57 }
 0x19d   : > { %3482 = vpow2.f32 %v3103_v36  ;;  %v3104_v42 = vmul.f32 -1.442695, %v1335_v38  ;;  %v3106_v43 = vmul.f32 -1.442695, %v4010_v39  ;;  %v1338_v44 = vadd.f32 %v1326_v11, %v1308_v40 }
 0x19e   : > { %v3105_v45 = vmul.f32 -1.442695, %v4012_v41  ;;  %v1914_v36 = vsub.s32 4, %v3983_v57 }
 0x19f   : > { %3484 = vpow2.f32 %v3104_v42  ;;  %v3107_v46 = vmul.f32 -1.442695, %v1338_v44  ;;  %v1664_v42 = vrot.slane %v4052_v34, %v3995_v62 }
 0x1a0   : > { %3486 = vpow2.f32 %v3106_v43  ;;  %v1668_v43 = vrot.slane %v4054_v35, %v3995_v62 }
 0x1a1   : > { %3488 = vpow2.f32 %v3105_v45  ;;  %v4069_v45 = vrot.slane %v4048_v32, %v1914_v36 }
 0x1a2   : > { %3490 = vpow2.f32 %v3107_v46  ;;  %v4072_v46 = vrot.slane %v4050_v33, %v1914_v36 }
 0x1a7   : > { %v3477_v47 = vpop.eup %3476 }
 0x1a8   : > { %v3479_v48 = vpop.eup %3478  ;;  %v1363_v49 = vadd.f32 1.0, %v3477_v47  ;;  %v4075_v47 = vrot.slane %v4052_v34, %v1914_v36 }
 0x1a9   : > { %v3481_v50 = vpop.eup %3480  ;;  %v1365_v51 = vadd.f32 1.0, %v3479_v48  ;;  %v4078_v48 = vrot.slane %v4054_v35, %v1914_v36 }
 0x1aa   : > { %v3483_v52 = vpop.eup %3482  ;;  %3492 = vrcp.f32 %v1363_v49  ;;  %v1364_v53 = vadd.f32 1.0, %v3481_v50  ;;  %v4081_v50 = vrot.slane %v4048_v32, %v2166_v37 }
 0x1ab   : > { %3494 = vrcp.f32 %v1365_v51  ;;  %v1366_v54 = vadd.f32 1.0, %v3483_v52  ;;  %v4084_v51 = vrot.slane %v4050_v33, %v2166_v37  ;;  %v4087_v52 = vrot.slane %v4052_v34, %v2166_v37 }
 0x1ac   : > { %v3485_v55 = vpop.eup %3484  ;;  %3496 = vrcp.f32 %v1364_v53  ;;  %v4091_v53 = vrot.slane %v4048_v32, %v3986_v60 }
 0x1ad   : > { %v3487_v56 = vpop.eup %3486  ;;  %3498 = vrcp.f32 %v1366_v54  ;;  %v1367_v58 = vadd.f32 1.0, %v3485_v55 }
 0x1ae   : > { %v3489_v59 = vpop.eup %3488  ;;  %v1369_v61 = vadd.f32 1.0, %v3487_v56  ;;  %v4097_v56 = vrot.slane %v4054_v35, %v2166_v37  ;;  %v4156_v37 = vrot.slane %v4050_v33, %v3989_v1 }
 0x1af   : > { %v3491_v2 = vpop.eup %3490  ;;  %3500 = vrcp.f32 %v1367_v58  ;;  %v1368_v3 = vadd.f32 1.0, %v3489_v59 }
 0x1b0   : > { %3502 = vrcp.f32 %v1369_v61  ;;  %v1370_v4 = vadd.f32 1.0, %v3491_v2 }
 0x1b1   : > { %3504 = vrcp.f32 %v1368_v3  ;;  %v4105_v3 = vrot.slane %v4052_v34, %v3989_v1 }
 0x1b2   : > { %3506 = vrcp.f32 %v1370_v4  ;;  %v4109_v4 = vrot.slane %v4054_v35, %v3989_v1 }
 0x1b7   : > { %v3493_v5 = vpop.eup %3492 }
 0x1b8   : > { %v3495_v6 = vpop.eup %3494  ;;  %v1387_v7 = vmul.f32 %v3493_v5, %v4004_v18  ;;  %v4113_v5 = vrot.slane %v4050_v33, %v3986_v60 }
 0x1b9   : > { %v3497_v8 = vpop.eup %3496  ;;  %v1389_v9 = vmul.f32 %v3495_v6, %v4006_v19  ;;  %v4117_v6 = vrot.slane %v4052_v34, %v3986_v60 }
 0x1ba   : > { %v3499_v10 = vpop.eup %3498  ;;  %1430 = vrot.lane.b32.xlu0 %v1387_v7, %s3744_s25  ;;  %v1512_v11 = vrot.slane %v1387_v7, 5  ;;  %v1388_v12 = vmul.f32 %v3497_v8, %v1332_v29 }
 0x1bb   : > { %1434 = vrot.lane.b32.xlu1 %v1389_v9, %s3744_s25  ;;  %v1514_v13 = vrot.slane %v1389_v9, 5  ;;  %v1390_v14 = vmul.f32 %v3499_v10, %v1334_v30  ;;  %v4128_v10 = vrot.slane %v4048_v32, %v3989_v1 }
 0x1bc   : > { %v3501_v15 = vpop.eup %3500  ;;  %1536 = vst [vmem:[#allocation3 + $0x40] sm:$0xf8] %v1512_v11  ;;  %v1513_v16 = vrot.slane %v1388_v12, 5 }
 0x1bd   : > { %v3503_v17 = vpop.eup %3502  ;;  %1538 = vst [vmem:[#allocation3 + $0x50] sm:$0xf8] %v1514_v13  ;;  %v1515_v20 = vrot.slane %v1390_v14, 5  ;;  %v1391_v18 = vmul.f32 %v3501_v15, %v1335_v38 }
 0x1be   : > { %v3505_v21 = vpop.eup %3504  ;;  %1403 = vrot.lane.b32.xlu0 %v1387_v7, %s3745_s30  ;;  %1537 = vst [vmem:[#allocation3 + $0x48] sm:$0xf8] %v1513_v16  ;;  %v1393_v19 = vmul.f32 %v3503_v17, %v4010_v39  ;;  %v1656_v39 = vrot.slane %v4048_v32, %v3995_v62 }
 0x1bf   : > { %v3507_v22 = vpop.eup %3506  ;;  %1539 = vst [vmem:[#allocation3 + $0x58] sm:$0xf8] %v1515_v20  ;;  %1436 = vrot.lane.b32.xlu1 %v1390_v14, %s3744_s25  ;;  %v1392_v23 = vmul.f32 %v3505_v21, %v4012_v41  ;;  %v1516_v24 = vrot.slane %v1391_v18, 5  ;;  %v4062_v41 = vrot.slane %v4050_v33, %v3995_v62 }
 0x1c0   : > { %v1394_v25 = vmul.f32 %v3507_v22, %v1338_v44  ;;  %v1520_v26 = vrot.slane %v1393_v19, 5 }
 0x1c1   : > { %v1518_v27 = vrot.slane %v1392_v23, 5  ;;  %1544 = vst [vmem:[#allocation3 + $0x80] sm:$0x7] %v1516_v24  ;;  %v4025_v28 = vsel %vm1511_vm1, %v1512_v11, %v1516_v24  ;;  %v4132_v11 = vrot.slane %v4048_v32, %v3998_v63 }
 0x1c2   : > { %1407 = vrot.lane.b32.xlu0 %v1389_v9, %s3745_s30  ;;  %v1522_v29 = vrot.slane %v1394_v25, 5  ;;  %v4029_v30 = vsel %vm1511_vm1, %v1514_v13, %v1520_v26  ;;  %1546 = vst [vmem:[#allocation3 + $0x90] sm:$0x7] %v1520_v26  ;;  %v4094_v55 = vmul.f32 %v1656_v39, %v4025_v28  ;;  %v4146_v24 = vmul.f32 %v4081_v50, %v4025_v28 }
 0x1c3   : > { %1405 = vrot.lane.b32.xlu1 %v1388_v12, %s3745_s30  ;;  %1545 = vst [vmem:[#allocation3 + $0x88] sm:$0x7] %v1518_v27  ;;  %v4033_v31 = vsel %vm1511_vm1, %v1513_v16, %v1518_v27  ;;  %v1641_v38 = vld [vmem:[#allocation3 + $0x40] sm:$0xfc]  ;;  %v4101_v2 = vmul.f32 %v1664_v42, %v4029_v30 }
 0x1c4   : > { %v4036_v0 = vsel %vm1511_vm1, %v1515_v20, %v1522_v29  ;;  %1547 = vst [vmem:[#allocation3 + $0x98] sm:$0x7] %v1522_v29  ;;  %v1643_v40 = vld [vmem:[#allocation3 + $0x50] sm:$0xfc]  ;;  %v1669_v49 = vmul.f32 %v1656_v39, %v1641_v38  ;;  %v4121_v7 = vmul.f32 %v4062_v41, %v4033_v31  ;;  %v1695_v15 = vrot.slane %v4094_v55, 2 }
 0x1c5   : > { %v1642_v44 = vld [vmem:[#allocation3 + $0x48] sm:$0xfc]  ;;  %v1671_v54 = vmul.f32 %v1664_v42, %v1643_v40  ;;  %v4124_v8 = vmul.f32 %v1668_v43, %v4036_v0  ;;  %v1904_v17 = vld [vmem:[#allocation3 + $0x40] sm:$0xf8]  ;;  %v1701_v21 = vrot.slane %v4101_v2, 2 }
 0x1c6   : > { %1432 = vrot.lane.b32.xlu0 %v1388_v12, %s3744_s25  ;;  %v1644_v58 = vld [vmem:[#allocation3 + $0x58] sm:$0xfc]  ;;  %v1670_v61 = vmul.f32 %v4062_v41, %v1642_v44  ;;  %v1694_v9 = vrot.slane %v1669_v49, 2  ;;  %v4136_v12 = vmul.f32 %v4069_v45, %v4025_v28  ;;  %v1906_v22 = vld [vmem:[#allocation3 + $0x50] sm:$0xf8]  ;;  %v1698_v29 = vrot.slane %v4121_v7, 2 }
 0x1c7   : > { %1409 = vrot.lane.b32.xlu1 %v1390_v14, %s3745_s30  ;;  %v1672_v13 = vmul.f32 %v1668_v43, %v1644_v58  ;;  %v1700_v16 = vrot.slane %v1671_v54, 2  ;;  %v1704_v36 = vrot.slane %v4124_v8, 2  ;;  %v4163_v28 = vrot.slane %v4050_v33, %v3998_v63  ;;  %v1907_v40 = vld [vmem:[#allocation3 + $0x58] sm:$0xf8] }
 0x1c8   : > { %v1649_v59 = vld [vmem:[#allocation3 + $0x80] sm:$0x3]  ;;  %v4159_v38 = vsel %vm1693_vm2, %v1694_v9, %v1695_v15  ;;  %v1928_v54 = vmul.f32 %v4069_v45, %v1904_v17 }
 0x1c9   : > { %v1677_v14 = vmul.f32 %v1656_v39, %v1649_v59  ;;  %v1651_v20 = vld [vmem:[#allocation3 + $0x90] sm:$0x3]  ;;  %4800 = vst [vmem:[#allocation21_spill] sm:$0xff] %v4163_v28  ;;  %v4167_v39 = vrot.slane %v4052_v34, %v3998_v63  ;;  %v1908_v44 = vld [vmem:[#allocation3 + $0x80] sm:$0x7]  ;;  %v4171_v58 = vsel %vm1693_vm2, %v1700_v16, %v1701_v21  ;;  %v1703_v59 = vrot.slane %v1672_v13, 2 }
 0x1ca   : > { %1438 = vrot.lane.b32.xlu0 %v1391_v18, %s3744_s25  ;;  %v1650_v26 = vld [vmem:[#allocation3 + $0x88] sm:$0x3]  ;;  %v1910_v49 = vld [vmem:[#allocation3 + $0x90] sm:$0x7]  ;;  %v1679_v55 = vmul.f32 %v1664_v42, %v1651_v20  ;;  %v1930_v42 = vmul.f32 %v4075_v47, %v1906_v22  ;;  %v1931_v16 = vmul.f32 %v4078_v48, %v1907_v40  ;;  %v1936_v13 = vmul.f32 %v4069_v45, %v1908_v44 }
 0x1cb   : > { %1440 = vrot.lane.b32.xlu1 %v1392_v23, %s3744_s25  ;;  %v1652_v27 = vld [vmem:[#allocation3 + $0x98] sm:$0x3]  ;;  %4801 = vst [vmem:[#allocation22_spill] sm:$0xff] %v4167_v39  ;;  %v1909_v2 = vld [vmem:[#allocation3 + $0x88] sm:$0x7]  ;;  %v1678_v8 = vmul.f32 %v4062_v41, %v1650_v26  ;;  %v4191_v20 = vsel %vm1693_vm2, %v1703_v59, %v1704_v36  ;;  %v1935_v45 = vmul.f32 %v4078_v48, %v4036_v0 }
 0x1cc   : > { %v1911_v7 = vld [vmem:[#allocation3 + $0x98] sm:$0x7]  ;;  %v1680_v9 = vmul.f32 %v1668_v43, %v1652_v27  ;;  %v1937_v41 = vmul.f32 %v4072_v46, %v1909_v2  ;;  %v1938_v43 = vmul.f32 %v4075_v47, %v1910_v49  ;;  %v1952_v27 = vrot.slane %v1928_v54, 3  ;;  %v2156_v54 = vld [vmem:[#allocation3 + $0x40] sm:$0xf0] }
 0x1cd   : > { %v1939_v17 = vmul.f32 %v4078_v48, %v1911_v7  ;;  %v1708_v22 = vrot.slane %v1678_v8, 2  ;;  %v1958_v40 = vrot.slane %v1930_v42, 3  ;;  %v1961_v44 = vrot.slane %v1931_v16, 3 }
 0x1ce   : > { %1442 = vrot.lane.b32.xlu0 %v1393_v19, %s3744_s25  ;;  %v1712_v26 = vrot.slane %v1680_v9, 2  ;;  %v1964_v49 = vrot.slane %v1936_v13, 3  ;;  %v1966_v59 = vrot.slane %v1937_v41, 3  ;;  %v1968_v7 = vrot.slane %v1938_v43, 3  ;;  %v2157_v13 = vld [vmem:[#allocation3 + $0x48] sm:$0xf0] }
 0x1cf   : > { %1444 = vrot.lane.b32.xlu1 %v1394_v25, %s3744_s25 }
 0x1d2   : > { %1411 = vrot.lane.b32.xlu0 %v1391_v18, %s3745_s30  ;;  %v1697_v18 = vrot.slane %v1670_v61, 2  ;;  %v1706_v61 = vrot.slane %v1677_v14, 2  ;;  %v1933_v14 = vmul.f32 %v4072_v46, %v4033_v31 }
 0x1d3   : > { %1413 = vrot.lane.b32.xlu1 %v1392_v23, %s3745_s30  ;;  %v4142_v23 = vmul.f32 %v4075_v47, %v4029_v30  ;;  %v1953_v47 = vrot.slane %v4136_v12, 3  ;;  %v4208_v12 = vsel %vm1693_vm2, %v1704_v36, %v1712_v26  ;;  %v4228_v36 = vsub.s32 6, %v3983_v57 }
 0x1d4   : > { %v4175_v28 = vsel %vm1693_vm2, %v1697_v18, %v1698_v29  ;;  %v4194_v18 = vsel %vm1693_vm2, %v1695_v15, %v1706_v61  ;;  %v1956_v2 = vrot.slane %v1933_v14, 3  ;;  %v1998_v61 = vsub.s32 5, %v3983_v57  ;;  %v2159_v14 = vld [vmem:[#allocation3 + $0x58] sm:$0xf0] }
 0x1d5   : > { %v1959_v48 = vrot.slane %v4142_v23, 3  ;;  %v4211_v8 = vsel %vm1556_vm3, %v1952_v27, %v1953_v47 }
 0x1d6   : > { %1415 = vrot.lane.b32.xlu0 %v1393_v19, %s3745_s30  ;;  %v1905_v19 = vld [vmem:[#allocation3 + $0x48] sm:$0xf8]  ;;  %v4233_v43 = vsel %vm1556_vm3, %v1956_v2, %v1966_v59  ;;  %v4243_v26 = vrot.slane %v4048_v32, %v1998_v61  ;;  %v4246_v57 = vrot.slane %v4050_v33, %v1998_v61  ;;  %v4249_v27 = vrot.slane %v4052_v34, %v1998_v61 }
 0x1d7   : > { %1417 = vrot.lane.b32.xlu1 %v1394_v25, %s3745_s30  ;;  %v4150_v25 = vrot.slane %v4054_v35, %v3986_v60  ;;  %v1929_v39 = vmul.f32 %v4072_v46, %v1905_v19  ;;  %v1710_v19 = vrot.slane %v1679_v55, 2  ;;  %v1962_v55 = vrot.slane %v1935_v45, 3  ;;  %v2160_v45 = vld [vmem:[#allocation3 + $0x80] sm:$0xf] }
 0x1d8   : > { %v4219_v23 = vsel %vm1556_vm3, %v1958_v40, %v1959_v48  ;;  %4805 = vst [vmem:[#allocation26_spill] sm:$0xff] %v4243_v26  ;;  %4806 = vst [vmem:[#allocation27_spill] sm:$0xff] %v4246_v57  ;;  %v2162_v40 = vld [vmem:[#allocation3 + $0x90] sm:$0xf]  ;;  %v2185_v59 = vmul.f32 %v4084_v51, %v4033_v31 }
 0x1d9   : > { %4799 = vst [vmem:[#allocation20_spill] sm:$0xff] %v4150_v25  ;;  %v4180_v25 = vrot.slane %v4054_v35, %v3998_v63  ;;  %v1955_v46 = vrot.slane %v1929_v39, 3  ;;  %v4200_v15 = vsel %vm1693_vm2, %v1701_v21, %v1710_v19  ;;  %v4205_v39 = vsel %vm1693_vm2, %v1698_v29, %v1708_v22  ;;  %v2158_v21 = vld [vmem:[#allocation3 + $0x50] sm:$0xf0] }
 0x1da   : > { %v4222_v16 = vsel %vm1556_vm3, %v1961_v44, %v1962_v55  ;;  %v4225_v29 = vsel %vm1556_vm3, %v1953_v47, %v1964_v49  ;;  %v2180_v22 = vmul.f32 %v4081_v50, %v2156_v54  ;;  %v2161_v47 = vld [vmem:[#allocation3 + $0x88] sm:$0xf]  ;;  %v2163_v44 = vld [vmem:[#allocation3 + $0x98] sm:$0xf]  ;;  %v2182_v49 = vmul.f32 %v4087_v52, %v2158_v21 }
 0x1db   : > { %4802 = vst [vmem:[#allocation23_spill] sm:$0xff] %v4180_v25  ;;  %v1970_v25 = vrot.slane %v1939_v17, 3  ;;  %v4214_v9 = vsel %vm1556_vm3, %v1955_v46, %v1956_v2  ;;  %v4236_v17 = vsel %vm1556_vm3, %v1959_v48, %v1968_v7  ;;  %v4252_v46 = vrot.slane %v4054_v35, %v1998_v61 }
 0x1dc   : > { %4803 = vst [vmem:[#allocation24_spill] sm:$0xff] %v4236_v17  ;;  %v2183_v2 = vmul.f32 %v4097_v56, %v2159_v14  ;;  %v4261_v48 = vrot.slane %v4048_v32, %v4228_v36  ;;  %v2187_v61 = vmul.f32 %v4097_v56, %v4036_v0  ;;  %v2188_v54 = vmul.f32 %v4081_v50, %v2160_v45 }
 0x1dd   : > { %v4239_v19 = vsel %vm1556_vm3, %v1962_v55, %v1970_v25  ;;  %v2181_v25 = vmul.f32 %v4084_v51, %v2157_v13  ;;  %v2186_v55 = vmul.f32 %v4087_v52, %v4029_v30  ;;  %v2189_v14 = vmul.f32 %v4084_v51, %v2161_v47 }
 0x1de   : > { %4804 = vst [vmem:[#allocation25_spill] sm:$0xff] %v4239_v19  ;;  %v2190_v31 = vmul.f32 %v4087_v52, %v2162_v40  ;;  %v2204_v57 = vrot.slane %v2180_v22, 4  ;;  %v2191_v50 = vmul.f32 %v4097_v56, %v2163_v44  ;;  %v2205_v51 = vrot.slane %v4146_v24, 4 }
 0x1df   : > { %v2207_v47 = vrot.slane %v2181_v25, 4  ;;  %v2208_v22 = vrot.slane %v2185_v59, 4  ;;  %v2210_v40 = vrot.slane %v2182_v49, 4  ;;  %v2213_v19 = vrot.slane %v2183_v2, 4 }
 0x1e0   : > { %v4292_v44 = vsel %vm1782_vm6, %v2204_v57, %v2205_v51  ;;  %v2211_v24 = vrot.slane %v2186_v55, 4  ;;  %v2218_v25 = vrot.slane %v2189_v14, 4  ;;  %v2220_v17 = vrot.slane %v2190_v31, 4 }
 0x1e1   : > { %4807 = vst [vmem:[#allocation28_spill] sm:$0xff] %v4292_v44  ;;  %v4302_v2 = vrot.slane %v4050_v33, %v4228_v36  ;;  %v2214_v59 = vrot.slane %v2187_v61, 4  ;;  %v4308_v57 = vrot.slane %v4052_v34, %v4228_v36  ;;  %v2222_v55 = vrot.slane %v2191_v50, 4 }
 0x1e2   : > { %v4314_v31 = vsel %vm1782_vm6, %v2210_v40, %v2211_v24 }
 0x1e3   : > { %4809 = vst [vmem:[#allocation30_spill] sm:$0xff] %v4314_v31  ;;  %v4317_v33 = vsel %vm1782_vm6, %v2213_v19, %v2214_v59 }
 0x1e4   : > { %4810 = vst [vmem:[#allocation31_spill] sm:$0xff] %v4317_v33 }
 0x22c   : > { %v4216_v42 = vpop.permute.xlu0 %1430 }
 0x22d   : > { %v4230_v41 = vpop.permute.xlu1 %1434 }
 0x230   : > { %v1404_v7 = vpop.permute.xlu0 %1403 }
 0x231   : > { %v1437_v13 = vpop.permute.xlu1 %1436  ;;  %v4269_v21 = vsel %vm1419_vm4, 0.0, %v1404_v7 }
 0x232   : > { %v4275_v32 = vsel %vm1446_vm5, %v4230_v41, %v1437_v13  ;;  %v4278_v30 = vsel %vm1446_vm5, %v1437_v13, 0.0  ;;  %v4761_v0 = vrot.slane %v4269_v21, 7  ;;  %v2216_v13 = vrot.slane %v2188_v54, 4 }
 0x233   : > { %v4762_v45 = vrot.slane %v4275_v32, 3  ;;  %v4765_v26 = vrot.slane %v4278_v30, 3 }
 0x234   : > { %1493 = vst [vmem:[#allocation3] sm:$0xfe] %v4761_v0  ;;  %v1408_v52 = vpop.permute.xlu0 %1407  ;;  %v4320_v61 = vsel %vm1782_vm6, %v2205_v51, %v2216_v13  ;;  %v4336_v51 = vsel %vm1782_vm6, %v2208_v22, %v2218_v25 }
 0x235   : > { %1583 = vst [vmem:[#allocation3 + $0x90] sm:$0xe0] %v4762_v45  ;;  %1584 = vst [vmem:[#allocation3 + $0x98] sm:$0xe0] %v4765_v26  ;;  %v1406_v56 = vpop.permute.xlu1 %1405 }
 0x236   : > { %v4295_v0 = vsel %vm1419_vm4, %v1404_v7, %v1406_v56  ;;  %v4298_v49 = vsel %vm1419_vm4, %v1406_v56, %v1408_v52  ;;  %v4311_v7 = vsel %vm1782_vm6, %v2207_v47, %v2208_v22  ;;  %4811 = vst [vmem:[#allocation32_spill] sm:$0xff] %v4320_v61  ;;  %v2325_v56 = vld [vmem:[%s4742_s4] sm:$0xf]  ;;  %4812 = vst [vmem:[#allocation33_spill] sm:$0xff] %v4336_v51  ;;  %v4352_v22 = vld [vmem:[#allocation9 + $0x38] ss:$0 sm:$0xff] }
 0x237   : > { %v4764_v54 = vrot.slane %v4295_v0, 7  ;;  %v4763_v45 = vrot.slane %v4298_v49, 7  ;;  %4808 = vst [vmem:[#allocation29_spill] sm:$0xff] %v4311_v7  ;;  %v4339_v47 = vsel %vm1782_vm6, %v2211_v24, %v2220_v17  ;;  %4815 = vst [vmem:[#allocation36_spill] sm:$0xff] %v4352_v22  ;;  %v4355_v24 = vsel %vm1782_vm6, %v2214_v59, %v2222_v55 }
 0x238   : > { %v1433_v14 = vpop.permute.xlu0 %1432  ;;  %4813 = vst [vmem:[#allocation34_spill] sm:$0xff] %v4339_v47  ;;  %4816 = vst [vmem:[#allocation37_spill] sm:$0xff] %v4355_v24  ;;  %v4361_v25 = vrot.slane %v2325_v56, %v3995_v62  ;;  %v4829_v44 = vrot.slane %v4295_v0, 7 }
 0x239   : > { %1494 = vst [vmem:[#allocation3 + $0x8] sm:$0xfe] %v4764_v54  ;;  %1495 = vst [vmem:[#allocation3 + $0x10] sm:$0xfe] %v4763_v45  ;;  %v1410_v34 = vpop.permute.xlu1 %1409  ;;  %v1447_v50 = vsel %vm1446_vm5, %v4216_v42, %v1433_v14  ;;  %v4333_v19 = vsel %vm1446_vm5, %v1433_v14, %v4230_v41  ;;  %v4347_v54 = vrot.slane %v4054_v35, %v4228_v36  ;;  %v4350_v14 = vld [vmem:[#allocation9 + $0x30] ss:$0 sm:$0xff] }
 0x23a   : > { %v4342_v40 = vsel %vm1419_vm4, %v1408_v52, %v1410_v34  ;;  %v1557_v13 = vrot.slane %v1447_v50, 3  ;;  %v4769_v45 = vrot.slane %v4333_v19, 3  ;;  %4814 = vst [vmem:[#allocation35_spill] sm:$0xff] %v4350_v14  ;;  %v4358_v52 = vrot.slane %v2325_v56, %v3986_v60  ;;  %4818 = vst [vmem:[#allocation39_spill] sm:$0xff] %v4361_v25 }
 0x23b   : > { %v1601_v42 = vld [vmem:[#allocation3] sm:$0xff]  ;;  %v4373_v60 = vrot.slane %v2325_v56, %v3989_v1  ;;  %v4820_v62 = vrot.slane %v4342_v40, 7  ;;  %v4387_v1 = vrot.slane %v2325_v56, %v3998_v63 }
 0x23c   : > { %v1819_v26 = vld [vmem:[#allocation3] sm:$0xfe]  ;;  %4817 = vst [vmem:[#allocation38_spill] sm:$0xff] %v4358_v52  ;;  %v1732_v35 = vld [vmem:[#allocation3 + $0x90] sm:$0xf0]  ;;  %v1439_v34 = vpop.permute.xlu0 %1438  ;;  %v1625_v50 = vmul.f32 %v4091_v53, %v1601_v42 }
 0x23d   : > { %v2072_v17 = vld [vmem:[#allocation3] sm:$0xfc]  ;;  %v1733_v36 = vld [vmem:[#allocation3 + $0x98] sm:$0xf0]  ;;  %1581 = vst [vmem:[#allocation3 + $0x80] sm:$0xe0] %v1557_v13  ;;  %v4367_v41 = vmul.f32 %v4132_v11, %v1819_v26  ;;  %v1441_v25 = vpop.permute.xlu1 %1440 }
 0x23e   : > { %1582 = vst [vmem:[#allocation3 + $0x88] sm:$0xe0] %v4769_v45  ;;  %v1990_v59 = vld [vmem:[#allocation3 + $0x90] sm:$0xe0]  ;;  %v4370_v55 = vmul.f32 %v4261_v48, %v2072_v17  ;;  %4819 = vst [vmem:[#allocation40_spill] sm:$0xff] %v4373_v60  ;;  %v4378_v45 = vmul.f32 %v4105_v3, %v1732_v35  ;;  %v4381_v42 = vmul.f32 %v4109_v4, %v1733_v36 }
 0x23f   : > { %1496 = vst [vmem:[#allocation3 + $0x18] sm:$0xfe] %v4820_v62  ;;  %v1991_v26 = vld [vmem:[#allocation3 + $0x98] sm:$0xe0]  ;;  %v4384_v52 = vmul.f32 %v4249_v27, %v1990_v59  ;;  %v2242_v17 = vld [vmem:[#allocation3 + $0x90] sm:$0xc0]  ;;  %v1450_v60 = vsel %vm1446_vm5, %v1439_v34, %v1441_v25  ;;  %v4391_v62 = vadd.f32 %v4159_v38, %v1625_v50 }
 0x240   : > { %v2243_v24 = vld [vmem:[#allocation3 + $0x98] sm:$0xc0]  ;;  %4821 = vst [vmem:[#allocation41_spill] sm:$0xff] %v4387_v1  ;;  %v4395_v47 = vmul.f32 %v4252_v46, %v1991_v26  ;;  %v1561_v36 = vrot.slane %v1450_v60, 3  ;;  %v1602_v33 = vld [vmem:[#allocation3 + $0x8] sm:$0xff]  ;;  %v1603_v63 = vld [vmem:[#allocation3 + $0x10] sm:$0xff]  ;;  %v1443_v56 = vpop.permute.xlu0 %1442  ;;  %v4403_v50 = vmul.f32 %v4350_v14, %v2242_v17 }
 0x241   : > { %v4406_v26 = vmul.f32 %v4352_v22, %v2243_v24  ;;  %v1445_v35 = vpop.permute.xlu1 %1444  ;;  %v1451_v61 = vsel %vm1446_vm5, %v1441_v25, %v1443_v56  ;;  %v1626_v59 = vmul.f32 %v4113_v5, %v1602_v33  ;;  %v1627_v51 = vmul.f32 %v4117_v6, %v1603_v63 }
 0x242   : > { %4822 = vst [vmem:[#allocation42_spill] sm:$0xff] %v4403_v50  ;;  %v4409_v60 = vsel %vm1556_vm3, %v1557_v13, %v1561_v36  ;;  %1589 = vst [vmem:[#allocation3 + $0xc0] sm:$0x1f] %v1561_v36  ;;  %v1456_v34 = vsel %vm1446_vm5, %v1445_v35, 0.0  ;;  %v1452_v38 = vsel %vm1446_vm5, %v1443_v56, %v1445_v35  ;;  %v1563_v17 = vrot.slane %v1451_v61, 3 }
 0x243   : > { %4823 = vst [vmem:[#allocation43_spill] sm:$0xff] %v4406_v26  ;;  %v4418_v24 = vmul.f32 %v4128_v10, %v4409_v60  ;;  %v1567_v26 = vrot.slane %v1456_v34, 3  ;;  %v1565_v36 = vrot.slane %v1452_v38, 3  ;;  %v4421_v50 = vadd.f32 %v4175_v28, %v1626_v59 }
 0x244   : > { %v1730_v1 = vld [vmem:[#allocation3 + $0x80] sm:$0xf0]  ;;  %v4424_v33 = vadd.f32 %v4171_v58, %v1627_v51  ;;  %v4824_v63 = vrot.slane %v4333_v19, 3  ;;  %1590 = vst [vmem:[#allocation3 + $0xc8] sm:$0x1f] %v1563_v17  ;;  %v1412_v61 = vpop.permute.xlu0 %1411  ;;  %v4825_v28 = vrot.slane %v4278_v30, 3 }
 0x245   : > { %v1731_v13 = vld [vmem:[#allocation3 + $0x88] sm:$0xf0]  ;;  %v1758_v56 = vmul.f32 %v4128_v10, %v1730_v1  ;;  %1592 = vst [vmem:[#allocation3 + $0xd8] sm:$0x1f] %v1567_v26  ;;  %v4826_v58 = vrot.slane %v4275_v32, 3  ;;  %v1414_v51 = vpop.permute.xlu1 %1413  ;;  %v1429_v38 = vsel %vm1419_vm4, 0.0, %v1412_v61 }
 0x246   : > { %v1604_v25 = vld [vmem:[#allocation3 + $0x18] sm:$0xff]  ;;  %v4429_v35 = vsel %vm1556_vm3, %v4824_v63, %v1563_v17  ;;  %v1759_v22 = vmul.f32 %v4156_v37, %v1731_v13  ;;  %v4437_v59 = vsel %vm1556_vm3, %v4825_v28, %v1567_v26  ;;  %1591 = vst [vmem:[#allocation3 + $0xd0] sm:$0x1f] %v1565_v36  ;;  %v4827_v1 = vld [vmem:[#allocation20_spill] sm:$0xff]  ;;  %v1423_v13 = vsel %vm1419_vm4, %v1412_v61, %v1414_v51 }
 0x247   : > { %v4442_v19 = vsel %vm1556_vm3, %v4826_v58, %v1565_v36  ;;  %v1628_v17 = vmul.f32 %v4827_v1, %v1604_v25  ;;  %v1473_v63 = vrot.slane %v1429_v38, 7  ;;  %v1763_v30 = vmul.f32 %v4156_v37, %v4429_v35 }
 0x248   : > { %v1764_v26 = vmul.f32 %v4105_v3, %v4442_v19  ;;  %v1475_v28 = vrot.slane %v1423_v13, 7  ;;  %v1765_v36 = vmul.f32 %v4109_v4, %v4437_v59  ;;  %v1783_v58 = vrot.slane %v1758_v56, 4  ;;  %v1416_v61 = vpop.permute.xlu0 %1415 }
 0x249   : > { %v1725_v32 = vadd.f32 %v4191_v20, %v1628_v17  ;;  %v1738_v34 = vld [vmem:[#allocation3 + $0xc0] sm:$0xf]  ;;  %v4828_v14 = vrot.slane %v4269_v21, 7  ;;  %1501 = vst [vmem:[#allocation3 + $0x40] sm:$0x1] %v1473_v63  ;;  %v1786_v38 = vrot.slane %v1759_v22, 4  ;;  %v1418_v20 = vpop.permute.xlu1 %1417  ;;  %v1424_v56 = vsel %vm1419_vm4, %v1414_v51, %v1416_v61 }
 0x24a   : > { %v1787_v31 = vrot.slane %v1763_v30, 4  ;;  %v1790_v7 = vrot.slane %v1764_v26, 4  ;;  %v4462_v13 = vsel %vm1468_vm7, %v4829_v44, %v1475_v28  ;;  %1502 = vst [vmem:[#allocation3 + $0x48] sm:$0x1] %v1475_v28  ;;  %v1425_v17 = vsel %vm1419_vm4, %v1416_v61, %v1418_v20 }
 0x24b   : > { %v4457_v25 = vsel %vm1468_vm7, %v4828_v14, %v1473_v63  ;;  %v1766_v14 = vmul.f32 %v4128_v10, %v1738_v34  ;;  %v1477_v63 = vrot.slane %v1424_v56, 7  ;;  %v1630_v22 = vmul.f32 %v4113_v5, %v4462_v13  ;;  %v1739_v30 = vld [vmem:[#allocation3 + $0xc8] sm:$0xf] }
 0x24c   : > { %v1629_v21 = vmul.f32 %v4091_v53, %v4457_v25  ;;  %v4830_v0 = vrot.slane %v4418_v24, 4  ;;  %v1479_v26 = vrot.slane %v1425_v17, 7  ;;  %v1788_v51 = vsel %vm1782_vm6, %v1786_v38, %v1787_v31  ;;  %v1741_v34 = vld [vmem:[#allocation3 + $0xd8] sm:$0xf] }
 0x24d   : > { %v4831_v53 = vrot.slane %v4378_v45, 4  ;;  %v1740_v61 = vld [vmem:[#allocation3 + $0xd0] sm:$0xf]  ;;  %v4832_v20 = vrot.slane %v4298_v49, 7  ;;  %1503 = vst [vmem:[#allocation3 + $0x50] sm:$0x1] %v1477_v63  ;;  %v1767_v56 = vmul.f32 %v4156_v37, %v1739_v30 }
 0x24e   : > { %v1785_v44 = vsel %vm1782_vm6, %v1783_v58, %v4830_v0  ;;  %v1726_v28 = vadd.f32 %v4194_v18, %v1629_v21  ;;  %v1727_v58 = vadd.f32 %v4205_v39, %v1630_v22  ;;  %v1793_v17 = vrot.slane %v1765_v36, 4  ;;  %1504 = vst [vmem:[#allocation3 + $0x58] sm:$0x1] %v1479_v26 }
 0x24f   : > { %v1791_v10 = vsel %vm1782_vm6, %v4831_v53, %v1790_v7  ;;  %v4482_v5 = vsel %vm1468_vm7, %v4832_v20, %v1477_v63  ;;  %v4833_v18 = vrot.slane %v4342_v40, 7  ;;  %v1768_v49 = vmul.f32 %v4105_v3, %v1740_v61  ;;  %v1821_v53 = vld [vmem:[#allocation3 + $0x10] sm:$0xfe]  ;;  %v1822_v3 = vld [vmem:[#allocation3 + $0x18] sm:$0xfe] }
 0x250   : > { %v1631_v38 = vmul.f32 %v4117_v6, %v4482_v5  ;;  %v1769_v21 = vmul.f32 %v4109_v4, %v1741_v34  ;;  %v4834_v37 = vrot.slane %v4381_v42, 4  ;;  %v1795_v63 = vrot.slane %v1766_v14, 4  ;;  %v1820_v6 = vld [vmem:[#allocation3 + $0x8] sm:$0xfe]  ;;  %v1823_v61 = vld [vmem:[#allocation3 + $0x40] sm:$0x1] }
 0x251   : > { %v4489_v45 = vsel %vm1468_vm7, %v4833_v18, %v1479_v26  ;;  %v1797_v40 = vrot.slane %v1767_v56, 4  ;;  %v1799_v0 = vrot.slane %v1768_v49, 4  ;;  %v1811_v26 = vadd.f32 %v1785_v44, %v4391_v62  ;;  %v1824_v56 = vld [vmem:[#allocation3 + $0x48] sm:$0x1] }
 0x252   : > { %v1632_v39 = vmul.f32 %v4827_v1, %v4489_v45  ;;  %v1794_v36 = vsel %vm1782_vm6, %v4834_v37, %v1793_v17  ;;  %v1728_v22 = vadd.f32 %v4200_v15, %v1631_v38  ;;  %v1801_v30 = vrot.slane %v1769_v21, 4  ;;  %v4836_v21 = vld [vmem:[#allocation21_spill] sm:$0xff]  ;;  %v4837_v37 = vld [vmem:[#allocation22_spill] sm:$0xff] }
 0x253   : > { %v4835_v34 = vrot.slane %v4418_v24, 4  ;;  %v1798_v42 = vsel %vm1782_vm6, %v1787_v31, %v1797_v40  ;;  %v1812_v14 = vadd.f32 %v1788_v51, %v4421_v50  ;;  %v1800_v15 = vsel %vm1782_vm6, %v1790_v7, %v1799_v0 }
 0x254   : > { %v1729_v4 = vadd.f32 %v4208_v12, %v1632_v39  ;;  %v1802_v20 = vsel %vm1782_vm6, %v1793_v17, %v1801_v30  ;;  %v1813_v62 = vadd.f32 %v1791_v10, %v4424_v33  ;;  %v1814_v44 = vadd.f32 %v1794_v36, %v1725_v32  ;;  %v1825_v24 = vld [vmem:[#allocation3 + $0x50] sm:$0x1] }
 0x255   : > { %v1796_v1 = vsel %vm1782_vm6, %v4835_v34, %v1795_v63  ;;  %v1816_v38 = vadd.f32 %v1798_v42, %v1727_v58  ;;  %v1817_v12 = vadd.f32 %v1800_v15, %v1728_v22  ;;  %v1844_v39 = vmul.f32 %v4836_v21, %v1820_v6  ;;  %v4838_v63 = vld [vmem:[#allocation23_spill] sm:$0xff]  ;;  %v1826_v51 = vld [vmem:[#allocation3 + $0x58] sm:$0x1] }
 0x256   : > { %v1815_v18 = vadd.f32 %v1796_v1, %v1726_v28  ;;  %v1818_v49 = vadd.f32 %v1802_v20, %v1729_v4  ;;  %v1845_v31 = vmul.f32 %v4837_v37, %v1821_v53  ;;  %v1846_v50 = vmul.f32 %v4838_v63, %v1822_v3 }
 0x257   : > { %v1847_v7 = vmul.f32 %v4132_v11, %v4457_v25  ;;  %v1848_v33 = vmul.f32 %v4836_v21, %v4462_v13  ;;  %v1849_v32 = vmul.f32 %v4837_v37, %v4482_v5  ;;  %v1850_v28 = vmul.f32 %v4838_v63, %v4489_v45 }
 0x258   : > { %v1851_v10 = vmul.f32 %v4132_v11, %v1823_v61  ;;  %v1852_v58 = vmul.f32 %v4836_v21, %v1824_v56  ;;  %v1853_v17 = vmul.f32 %v4837_v37, %v1825_v24  ;;  %v1854_v36 = vmul.f32 %v4838_v63, %v1826_v51 }
 0x259   : > { %v1869_v40 = vrot.slane %v1847_v7, 1  ;;  %v1871_v22 = vrot.slane %v1844_v39, 1  ;;  %v1872_v0 = vrot.slane %v1848_v33, 1  ;;  %v1874_v30 = vrot.slane %v1845_v31, 1  ;;  %v1988_v33 = vld [vmem:[#allocation3 + $0x80] sm:$0xe0] }
 0x25a   : > { %v1875_v6 = vrot.slane %v1849_v32, 1  ;;  %v4839_v53 = vrot.slane %v4367_v41, 1  ;;  %v1877_v4 = vrot.slane %v1846_v50, 1  ;;  %v1878_v34 = vrot.slane %v1850_v28, 1  ;;  %v1989_v32 = vld [vmem:[#allocation3 + $0x88] sm:$0xe0] }
 0x25b   : > { %v1880_v1 = vrot.slane %v1851_v10, 1  ;;  %v1873_v11 = vsel %vm1867_vm8, %v1871_v22, %v1872_v0  ;;  %v1882_v61 = vrot.slane %v1852_v58, 1  ;;  %v1884_v15 = vrot.slane %v1853_v17, 1  ;;  %v4840_v22 = vld [vmem:[#allocation24_spill] sm:$0xff] }
 0x25c   : > { %v1870_v3 = vsel %vm1867_vm8, %v4839_v53, %v1869_v40  ;;  %v1876_v42 = vsel %vm1867_vm8, %v1874_v30, %v1875_v6  ;;  %v1879_v20 = vsel %vm1867_vm8, %v1877_v4, %v1878_v34  ;;  %v1886_v24 = vrot.slane %v1854_v36, 1  ;;  %v4842_v30 = vld [vmem:[#allocation26_spill] sm:$0xff] }
 0x25d   : > { %v1881_v56 = vsel %vm1867_vm8, %v1869_v40, %v1880_v1  ;;  %v1896_v21 = vadd.f32 %v1870_v3, %v1811_v26  ;;  %v1883_v39 = vsel %vm1867_vm8, %v1872_v0, %v1882_v61  ;;  %v1885_v41 = vsel %vm1867_vm8, %v1875_v6, %v1884_v15  ;;  %v1992_v26 = vld [vmem:[#allocation3 + $0xc0] sm:$0x1f] }
 0x25e   : > { %v1897_v37 = vadd.f32 %v1873_v11, %v1812_v14  ;;  %v1898_v31 = vadd.f32 %v1876_v42, %v1813_v62  ;;  %v1887_v63 = vsel %vm1867_vm8, %v1878_v34, %v1886_v24  ;;  %v1899_v50 = vadd.f32 %v1879_v20, %v1814_v44  ;;  %v1993_v44 = vld [vmem:[#allocation3 + $0xc8] sm:$0x1f]  ;;  %v4843_v6 = vld [vmem:[#allocation27_spill] sm:$0xff] }
 0x25f   : > { %v1900_v7 = vadd.f32 %v1881_v56, %v1815_v18  ;;  %v1901_v51 = vadd.f32 %v1883_v39, %v1816_v38  ;;  %v1902_v28 = vadd.f32 %v1885_v41, %v1817_v12  ;;  %v1903_v10 = vadd.f32 %v1887_v63, %v1818_v49  ;;  %v1994_v18 = vld [vmem:[#allocation3 + $0xd0] sm:$0x1f]  ;;  %v1995_v38 = vld [vmem:[#allocation3 + $0xd8] sm:$0x1f] }
 0x260   : > { %v1980_v58 = vadd.f32 %v4211_v8, %v1896_v21  ;;  %v1981_v17 = vadd.f32 %v4214_v9, %v1897_v37  ;;  %v1982_v36 = vadd.f32 %v4219_v23, %v1898_v31  ;;  %v1983_v40 = vadd.f32 %v4222_v16, %v1899_v50  ;;  %v4841_v12 = vld [vmem:[#allocation25_spill] sm:$0xff] }
 0x261   : > { %v1984_v14 = vadd.f32 %v4225_v29, %v1900_v7  ;;  %v1985_v62 = vadd.f32 %v4233_v43, %v1901_v51  ;;  %v1986_v0 = vadd.f32 %v4840_v22, %v1902_v28  ;;  %v1987_v49 = vadd.f32 %v4841_v12, %v1903_v10  ;;  %v2073_v51 = vld [vmem:[#allocation3 + $0x8] sm:$0xfc]  ;;  %v2077_v12 = vld [vmem:[#allocation3 + $0x48] sm:$0x3] }
 0x262   : > { %v2012_v8 = vmul.f32 %v4842_v30, %v1988_v33  ;;  %v2013_v9 = vmul.f32 %v4843_v6, %v1989_v32  ;;  %v2016_v23 = vmul.f32 %v4842_v30, %v4409_v60  ;;  %v2017_v16 = vmul.f32 %v4843_v6, %v4429_v35  ;;  %v2074_v33 = vld [vmem:[#allocation3 + $0x10] sm:$0xfc] }
 0x263   : > { %v2018_v29 = vmul.f32 %v4249_v27, %v4442_v19  ;;  %v2019_v43 = vmul.f32 %v4252_v46, %v4437_v59  ;;  %v2020_v53 = vmul.f32 %v4842_v30, %v1992_v26  ;;  %v2021_v3 = vmul.f32 %v4843_v6, %v1993_v44  ;;  %v2075_v44 = vld [vmem:[#allocation3 + $0x18] sm:$0xfc]  ;;  %v2078_v30 = vld [vmem:[#allocation3 + $0x50] sm:$0x3] }
 0x264   : > { %v2022_v4 = vmul.f32 %v4249_v27, %v1994_v18  ;;  %v2023_v34 = vmul.f32 %v4252_v46, %v1995_v38  ;;  %v2036_v1 = vrot.slane %v2012_v8, 5  ;;  %v2037_v11 = vrot.slane %v2016_v23, 5 }
 0x265   : > { %v2039_v42 = vrot.slane %v2013_v9, 5  ;;  %v2040_v61 = vrot.slane %v2017_v16, 5  ;;  %v2043_v15 = vrot.slane %v2018_v29, 5  ;;  %v2046_v20 = vrot.slane %v2019_v43, 5  ;;  %v2079_v9 = vld [vmem:[#allocation3 + $0x58] sm:$0x3] }
 0x266   : > { %v2048_v56 = vrot.slane %v2020_v53, 5  ;;  %v2050_v24 = vrot.slane %v2021_v3, 5  ;;  %v2038_v21 = vsel %vm1511_vm1, %v2036_v1, %v2037_v11  ;;  %v2052_v41 = vrot.slane %v2022_v4, 5 }
 0x267   : > { %v2041_v39 = vsel %vm1511_vm1, %v2039_v42, %v2040_v61  ;;  %v2054_v37 = vrot.slane %v2023_v34, 5  ;;  %v4844_v31 = vrot.slane %v4384_v52, 5  ;;  %v4845_v46 = vrot.slane %v4395_v47, 5  ;;  %v2076_v47 = vld [vmem:[#allocation3 + $0x40] sm:$0x3] }
 0x268   : > { %v2049_v50 = vsel %vm1511_vm1, %v2037_v11, %v2048_v56  ;;  %v2051_v7 = vsel %vm1511_vm1, %v2040_v61, %v2050_v24  ;;  %v2053_v32 = vsel %vm1511_vm1, %v2043_v15, %v2052_v41  ;;  %v2064_v10 = vadd.f32 %v2038_v21, %v1980_v58 }
 0x269   : > { %v2044_v27 = vsel %vm1511_vm1, %v4844_v31, %v2043_v15  ;;  %v2047_v63 = vsel %vm1511_vm1, %v4845_v46, %v2046_v20  ;;  %v2055_v28 = vsel %vm1511_vm1, %v2046_v20, %v2054_v37  ;;  %v2065_v26 = vadd.f32 %v2041_v39, %v1981_v17  ;;  %v3109_v37 = vld [vmem:[#allocation9 + $0x28] ss:$0 sm:$0xff] }
 0x26a   : > { %v2066_v52 = vadd.f32 %v2044_v27, %v1982_v36  ;;  %v2067_v18 = vadd.f32 %v2047_v63, %v1983_v40  ;;  %v2068_v38 = vadd.f32 %v2049_v50, %v1984_v14  ;;  %v2069_v22 = vadd.f32 %v2051_v7, %v1985_v62  ;;  %v2240_v50 = vld [vmem:[#allocation3 + $0x80] sm:$0xc0]  ;;  %v2241_v7 = vld [vmem:[#allocation3 + $0x88] sm:$0xc0] }
 0x26b   : > { %v2070_v8 = vadd.f32 %v2053_v32, %v1986_v0  ;;  %v2071_v6 = vadd.f32 %v2055_v28, %v1987_v49  ;;  %v2097_v23 = vmul.f32 %v4302_v2, %v2073_v51  ;;  %v2098_v16 = vmul.f32 %v4308_v57, %v2074_v33  ;;  %v4847_v51 = vld [vmem:[#allocation28_spill] sm:$0xff]  ;;  %v4848_v32 = vld [vmem:[#allocation29_spill] sm:$0xff] }
 0x26c   : > { %v2099_v29 = vmul.f32 %v4347_v54, %v2075_v44  ;;  %v2100_v58 = vmul.f32 %v4261_v48, %v4457_v25  ;;  %v2101_v17 = vmul.f32 %v4302_v2, %v4462_v13  ;;  %v2102_v36 = vmul.f32 %v4308_v57, %v4482_v5  ;;  %v4850_v44 = vld [vmem:[#allocation31_spill] sm:$0xff] }
 0x26d   : > { %v2103_v40 = vmul.f32 %v4347_v54, %v4489_v45  ;;  %v2104_v14 = vmul.f32 %v4261_v48, %v2076_v47  ;;  %v2105_v62 = vmul.f32 %v4302_v2, %v2077_v12  ;;  %v2106_v0 = vmul.f32 %v4308_v57, %v2078_v30  ;;  %v2244_v12 = vld [vmem:[#allocation3 + $0xc0] sm:$0x3f]  ;;  %v2245_v30 = vld [vmem:[#allocation3 + $0xc8] sm:$0x3f] }
 0x26e   : > { %v2107_v49 = vmul.f32 %v4347_v54, %v2079_v9  ;;  %v2121_v43 = vrot.slane %v2100_v58, 2  ;;  %v2123_v53 = vrot.slane %v2097_v23, 2  ;;  %v2124_v25 = vrot.slane %v2101_v17, 2  ;;  %v4851_v9 = vld [vmem:[#allocation32_spill] sm:$0xff] }
 0x26f   : > { %v2126_v3 = vrot.slane %v2098_v16, 2  ;;  %v2127_v4 = vrot.slane %v2102_v36, 2  ;;  %v2129_v13 = vrot.slane %v2099_v29, 2  ;;  %v2130_v34 = vrot.slane %v2103_v40, 2  ;;  %v2246_v16 = vld [vmem:[#allocation3 + $0xd0] sm:$0x3f] }
 0x270   : > { %v4846_v5 = vrot.slane %v4370_v55, 2  ;;  %v2125_v45 = vsel %vm1693_vm2, %v2123_v53, %v2124_v25  ;;  %v2132_v48 = vrot.slane %v2104_v14, 2  ;;  %v2134_v11 = vrot.slane %v2105_v62, 2  ;;  %v3108_v55 = vld [vmem:[#allocation9 + $0x20] ss:$0 sm:$0xff] }
 0x271   : > { %v2128_v2 = vsel %vm1693_vm2, %v2126_v3, %v2127_v4  ;;  %v2131_v54 = vsel %vm1693_vm2, %v2129_v13, %v2130_v34  ;;  %v2136_v57 = vrot.slane %v2106_v0, 2  ;;  %v2138_v42 = vrot.slane %v2107_v49, 2  ;;  %v2247_v29 = vld [vmem:[#allocation3 + $0xd8] sm:$0x3f]  ;;  %v4855_v14 = vld [vmem:[#allocation35_spill] sm:$0xff]  ;;  %v4856_v0 = vld [vmem:[#allocation36_spill] sm:$0xff] }
 0x272   : > { %v2122_v1 = vsel %vm1693_vm2, %v4846_v5, %v2121_v43  ;;  %v2133_v61 = vsel %vm1693_vm2, %v2121_v43, %v2132_v48  ;;  %v2135_v15 = vsel %vm1693_vm2, %v2124_v25, %v2134_v11  ;;  %v2149_v56 = vadd.f32 %v2125_v45, %v2065_v26  ;;  %v4858_v48 = vld [vmem:[#allocation43_spill] sm:$0xff] }
 0x273   : > { %v2148_v20 = vadd.f32 %v2122_v1, %v2064_v10  ;;  %v2137_v24 = vsel %vm1693_vm2, %v2127_v4, %v2136_v57  ;;  %v2139_v21 = vsel %vm1693_vm2, %v2130_v34, %v2138_v42  ;;  %v2150_v39 = vadd.f32 %v2128_v2, %v2066_v52  ;;  %v4849_v10 = vld [vmem:[#allocation30_spill] sm:$0xff] }
 0x274   : > { %v2151_v41 = vadd.f32 %v2131_v54, %v2067_v18  ;;  %v2152_v31 = vadd.f32 %v2133_v61, %v2068_v38  ;;  %v2153_v27 = vadd.f32 %v2135_v15, %v2069_v22  ;;  %v2154_v46 = vadd.f32 %v2137_v24, %v2070_v8  ;;  %v4852_v18 = vld [vmem:[#allocation33_spill] sm:$0xff]  ;;  %v4853_v38 = vld [vmem:[#allocation34_spill] sm:$0xff] }
 0x275   : > { %v2155_v63 = vadd.f32 %v2139_v21, %v2071_v6  ;;  %v2232_v33 = vadd.f32 %v4847_v51, %v2148_v20  ;;  %v2233_v28 = vadd.f32 %v4848_v32, %v2149_v56  ;;  %v2234_v26 = vadd.f32 %v4849_v10, %v2150_v39  ;;  %v4854_v8 = vld [vmem:[#allocation37_spill] sm:$0xff]  ;;  %v4857_v1 = vld [vmem:[#allocation42_spill] sm:$0xff]  ;;  %v4860_v51 = vld [vmem:[#allocation39_spill] sm:$0xff] }
 0x276   : > { %v2235_v47 = vadd.f32 %v4850_v44, %v2151_v41  ;;  %v2236_v52 = vadd.f32 %v4851_v9, %v2152_v31  ;;  %v2237_v23 = vadd.f32 %v4852_v18, %v2153_v27  ;;  %v2238_v22 = vadd.f32 %v4853_v38, %v2154_v46  ;;  %v4861_v10 = vld [vmem:[#allocation40_spill] sm:$0xff] }
 0x277   : > { %v2239_v6 = vadd.f32 %v4854_v8, %v2155_v63  ;;  %v2264_v58 = vmul.f32 %v3108_v55, %v2240_v50  ;;  %v2265_v17 = vmul.f32 %v3109_v37, %v2241_v7  ;;  %v2268_v36 = vmul.f32 %v3108_v55, %v4409_v60  ;;  %v4859_v50 = vld [vmem:[#allocation38_spill] sm:$0xff] }
 0x278   : > { %v2269_v40 = vmul.f32 %v3109_v37, %v4429_v35  ;;  %v2270_v62 = vmul.f32 %v4855_v14, %v4442_v19  ;;  %v2271_v49 = vmul.f32 %v4856_v0, %v4437_v59  ;;  %v2272_v43 = vmul.f32 %v3108_v55, %v2244_v12 }
 0x279   : > { %v2273_v53 = vmul.f32 %v3109_v37, %v2245_v30  ;;  %v2274_v25 = vmul.f32 %v4855_v14, %v2246_v16  ;;  %v2275_v3 = vmul.f32 %v4856_v0, %v2247_v29  ;;  %v2289_v4 = vrot.slane %v2264_v58, 6 }
 0x27a   : > { %v2290_v13 = vrot.slane %v2268_v36, 6  ;;  %v2292_v34 = vrot.slane %v2265_v17, 6  ;;  %v2293_v5 = vrot.slane %v2269_v40, 6  ;;  %v2295_v60 = vrot.slane %v4857_v1, 6 }
 0x27b   : > { %v2296_v45 = vrot.slane %v2270_v62, 6  ;;  %v2298_v19 = vrot.slane %v4858_v48, 6  ;;  %v2299_v11 = vrot.slane %v2271_v49, 6  ;;  %v2301_v2 = vrot.slane %v2272_v43, 6 }
 0x27c   : > { %v2291_v35 = vsel %vm2288_vm9, %v2289_v4, %v2290_v13  ;;  %v2294_v59 = vsel %vm2288_vm9, %v2292_v34, %v2293_v5  ;;  %v2303_v57 = vrot.slane %v2273_v53, 6  ;;  %v2305_v42 = vrot.slane %v2274_v25, 6 }
 0x27d   : > { %v2297_v54 = vsel %vm2288_vm9, %v2295_v60, %v2296_v45  ;;  %v2300_v61 = vsel %vm2288_vm9, %v2298_v19, %v2299_v11  ;;  %v2302_v15 = vsel %vm2288_vm9, %v2290_v13, %v2301_v2  ;;  %v2307_v20 = vrot.slane %v2275_v3, 6 }
 0x27e   : > { %v2317_v56 = vadd.f32 %v2291_v35, %v2232_v33  ;;  %v2304_v55 = vsel %vm2288_vm9, %v2293_v5, %v2303_v57  ;;  %v2306_v24 = vsel %vm2288_vm9, %v2296_v45, %v2305_v42  ;;  %v2318_v21 = vadd.f32 %v2294_v59, %v2233_v28  ;;  %v4862_v33 = vld [vmem:[#allocation41_spill] sm:$0xff] }
 0x27f   : > { %v2319_v39 = vadd.f32 %v2297_v54, %v2234_v26  ;;  %v2308_v41 = vsel %vm2288_vm9, %v2299_v11, %v2307_v20  ;;  %v2320_v37 = vadd.f32 %v2300_v61, %v2235_v47  ;;  %v2321_v31 = vadd.f32 %v2302_v15, %v2236_v52 }
 0x280   : > { %v2322_v27 = vadd.f32 %v2304_v55, %v2237_v23  ;;  %v2323_v46 = vadd.f32 %v2306_v24, %v2238_v22  ;;  %v2324_v63 = vadd.f32 %v2308_v41, %v2239_v6  ;;  %v2347_v7 = vadd.f32 %v4859_v50, %v2317_v56 }
 0x281   : > { %v2348_v32 = vadd.f32 %v4860_v51, %v2318_v21  ;;  %v2349_v44 = vadd.f32 %v4861_v10, %v2319_v39  ;;  %v2350_v12 = vadd.f32 %v4862_v33, %v2320_v37  ;;  %v2351_v30 = vadd.f32 %v4859_v50, %v2321_v31 }
 0x282   : > { %v2352_v28 = vadd.f32 %v4860_v51, %v2322_v27  ;;  %v2353_v26 = vadd.f32 %v4861_v10, %v2323_v46  ;;  %v3112_v9 = vmul.f32 -1.442695, %v2347_v7  ;;  %v2354_v52 = vadd.f32 %v4862_v33, %v2324_v63 }
 0x283   : > { %v3113_v47 = vmul.f32 -1.442695, %v2348_v32  ;;  %v3114_v18 = vmul.f32 -1.442695, %v2349_v44  ;;  %v3115_v23 = vmul.f32 -1.442695, %v2350_v12 }
 0x284   : > { %3508 = vpow2.f32 %v3112_v9  ;;  %v3116_v38 = vmul.f32 -1.442695, %v2351_v30  ;;  %v3117_v22 = vmul.f32 -1.442695, %v2352_v28  ;;  %v3118_v8 = vmul.f32 -1.442695, %v2353_v26 }
 0x285   : > { %3510 = vpow2.f32 %v3113_v47  ;;  %v3119_v6 = vmul.f32 -1.442695, %v2354_v52 }
 0x286   : > { %3512 = vpow2.f32 %v3114_v18 }
 0x287   : > { %3514 = vpow2.f32 %v3115_v23 }
 0x288   : > { %3516 = vpow2.f32 %v3116_v38 }
 0x289   : > { %3518 = vpow2.f32 %v3117_v22 }
 0x28a   : > { %3520 = vpow2.f32 %v3118_v8 }
 0x28b   : > { %3522 = vpow2.f32 %v3119_v6 }
 0x291   : > { %v3509_v16 = vpop.eup %3508 }
 0x292   : > { %v3511_v29 = vpop.eup %3510  ;;  %v2379_v58 = vadd.f32 1.0, %v3509_v16 }
 0x293   : > { %v3513_v17 = vpop.eup %3512  ;;  %v2380_v36 = vadd.f32 1.0, %v3511_v29 }
 0x294   : > { %v3515_v40 = vpop.eup %3514  ;;  %v2381_v14 = vadd.f32 1.0, %v3513_v17  ;;  %3524 = vrcp.f32 %v2379_v58 }
 0x295   : > { %v3517_v62 = vpop.eup %3516  ;;  %v2382_v0 = vadd.f32 1.0, %v3515_v40  ;;  %3526 = vrcp.f32 %v2380_v36  ;;  %v2453_v36 = vld [vmem:[%s4743_s5] sm:$0x3]  ;;  %v4863_v40 = vld [vmem:[#allocation19_spill] sm:$0xff] }
 0x296   : > { %v3519_v49 = vpop.eup %3518  ;;  %v2383_v43 = vadd.f32 1.0, %v3517_v62  ;;  %3528 = vrcp.f32 %v2381_v14 }
 0x297   : > { %v3521_v53 = vpop.eup %3520  ;;  %v2384_v25 = vadd.f32 1.0, %v3519_v49  ;;  %3530 = vrcp.f32 %v2382_v0  ;;  %v2463_v49 = vld [vmem:[%s4744_s6] sm:$0x3] }
 0x298   : > { %v3523_v3 = vpop.eup %3522  ;;  %v2385_v4 = vadd.f32 1.0, %v3521_v53  ;;  %3532 = vrcp.f32 %v2383_v43 }
 0x299   : > { %v2386_v13 = vadd.f32 1.0, %v3523_v3  ;;  %3534 = vrcp.f32 %v2384_v25 }
 0x29a   : > { %3536 = vrcp.f32 %v2385_v4 }
 0x29b   : > { %3538 = vrcp.f32 %v2386_v13 }
 0x2a1   : > { %v3525_v34 = vpop.eup %3524 }
 0x2a2   : > { %v3527_v5 = vpop.eup %3526  ;;  %v4629_v48 = vmul.f32 %v3525_v34, %v2347_v7 }
 0x2a3   : > { %v3529_v1 = vpop.eup %3528  ;;  %v4633_v2 = vmul.f32 %v3527_v5, %v2348_v32  ;;  %v3444_v5 = vld [vmem:[#allocation10 + $0x78] sm:$0xff]  }
 0x2a4   : > { %v3531_v60 = vpop.eup %3530  ;;  %v4637_v57 = vmul.f32 %v3529_v1, %v2349_v44  ;;  %v3445_v1 = vld [vmem:[#allocation10 + $0xf8] sm:$0xff]   ;;  %3162 = vmatprep.subr.bf16.mxu0 %v3444_v5 }
 0x2a5   : > { %v3533_v45 = vpop.eup %3532  ;;  %v4643_v15 = vmul.f32 %v3531_v60, %v2350_v12  ;;  %v3446_v60 = vld [vmem:[#allocation10 + $0x38] sm:$0xff]   ;;  %3184 = vmatprep.subr.bf16.mxu1 %v3445_v1 }
 0x2a6   : > { %v3535_v35 = vpop.eup %3534  ;;  %v4631_v19 = vmul.f32 %v3533_v45, %v2351_v30  ;;  %v3447_v45 = vld [vmem:[#allocation10 + $0xb8] sm:$0xff]   ;;  %3163 = vmatpush3.bf16.msra.mxu0 %v3446_v60 }
 0x2a7   : > { %v3537_v11 = vpop.eup %3536  ;;  %v4635_v59 = vmul.f32 %v3535_v35, %v2352_v28  ;;  %v3448_v35 = vld [vmem:[#allocation10 + $0x70] sm:$0xff]   ;;  %3185 = vmatpush3.bf16.msra.mxu1 %v3447_v45 }
 0x2a8   : > { %v3539_v54 = vpop.eup %3538  ;;  %v4639_v42 = vmul.f32 %v3537_v11, %v2353_v26  ;;  %v2411_v61 = vadd.f32 %v4631_v19, %v4629_v48  ;;  %v3449_v11 = vld [vmem:[#allocation10 + $0xf0] sm:$0xff]   ;;  %3164 = vmatprep.subr.bf16.mxu0 %v3448_v35 }
 0x2a9   : > { %v4645_v20 = vmul.f32 %v3539_v54, %v2354_v52  ;;  %v2418_v56 = vadd.f32 %v4635_v59, %v4633_v2  ;;  %v3450_v54 = vld [vmem:[#allocation10 + $0x30] sm:$0xff]   ;;  %3186 = vmatprep.subr.bf16.mxu1 %v3449_v11 }
 0x2aa   : > { %v2412_v55 = vrot.slane %v2411_v61, 4  ;;  %v2425_v24 = vadd.f32 %v4639_v42, %v4637_v57  ;;  %3165 = vmatpush3.bf16.msra.mxu0 %v3450_v54 }
 0x2ab   : > { %v2419_v21 = vrot.slane %v2418_v56, 4  ;;  %v2432_v39 = vadd.f32 %v4645_v20, %v4643_v15 }
 0x2ac   : > { %v2413_v41 = vadd.f32 %v2412_v55, %v2411_v61  ;;  %v2426_v37 = vrot.slane %v2425_v24, 4  ;;  %v3451_v61 = vld [vmem:[#allocation10 + $0xb0] sm:$0xff]   ;;  %v3453_v55 = vld [vmem:[#allocation10 + $0xe8] sm:$0xff]  }
 0x2ad   : > { %v2420_v31 = vadd.f32 %v2419_v21, %v2418_v56  ;;  %v2433_v27 = vrot.slane %v2432_v39, 4  ;;  %v3452_v56 = vld [vmem:[#allocation10 + $0x68] sm:$0xff]   ;;  %3187 = vmatpush3.bf16.msra.mxu1 %v3451_v61 }
 0x2ae   : > { %v2414_v46 = vrot.slane %v2413_v41, 2  ;;  %v2427_v63 = vadd.f32 %v2426_v37, %v2425_v24  ;;  %v3454_v24 = vld [vmem:[#allocation10 + $0x28] sm:$0xff]   ;;  %3166 = vmatprep.subr.bf16.mxu0 %v3452_v56  ;;  %3188 = vmatprep.subr.bf16.mxu1 %v3453_v55  ;;  %v3458_v37 = vld [vmem:[#allocation10 + $0x20] sm:$0xff]  }
 0x2af   : > { %v2421_v50 = vrot.slane %v2420_v31, 2  ;;  %v2434_v7 = vadd.f32 %v2433_v27, %v2432_v39  ;;  %v3455_v21 = vld [vmem:[#allocation10 + $0xa8] sm:$0xff]   ;;  %v3456_v39 = vld [vmem:[#allocation10 + $0x60] sm:$0xff]   ;;  %3167 = vmatpush3.bf16.msra.mxu0 %v3454_v24 }
 0x2b0   : > { %v2415_v51 = vadd.f32 %v2414_v46, %v2413_v41  ;;  %v2428_v32 = vrot.slane %v2427_v63, 2  ;;  %v3457_v41 = vld [vmem:[#allocation10 + $0xe0] sm:$0xff]   ;;  %3168 = vmatprep.subr.bf16.mxu0 %v3456_v39  ;;  %v2472_v27 = vld [vmem:[%s4745_s7] sm:$0x3] }
 0x2b1   : > { %v2422_v10 = vadd.f32 %v2421_v50, %v2420_v31  ;;  %v2435_v44 = vrot.slane %v2434_v7, 2  ;;  %3189 = vmatpush3.bf16.msra.mxu1 %v3455_v21  ;;  %v3459_v31 = vld [vmem:[#allocation10 + $0xa0] sm:$0xff]  }
 0x2b2   : > { %v2416_v33 = vrot.slane %v2415_v51, 1  ;;  %v2429_v12 = vadd.f32 %v2428_v32, %v2427_v63  ;;  %3190 = vmatprep.subr.bf16.mxu1 %v3457_v41 }
 0x2b3   : > { %v2423_v30 = vrot.slane %v2422_v10, 1  ;;  %v2436_v28 = vadd.f32 %v2435_v44, %v2434_v7  ;;  %3169 = vmatpush3.bf16.msra.mxu0 %v3458_v37 }
 0x2b4   : > { %v2430_v26 = vrot.slane %v2429_v12, 1  ;;  %v2417_v47 = vadd.f32 %v2416_v33, %v2415_v51  ;;  %v2486_v33 = vld [vmem:[%s4746_s8] sm:$0x1] }
 0x2b5   : > { %v2437_v9 = vrot.slane %v2436_v28, 1  ;;  %v2424_v18 = vadd.f32 %v2423_v30, %v2422_v10  ;;  %3191 = vmatpush3.bf16.msra.mxu1 %v3459_v31 }
 0x2b6   : > { %v2431_v52 = vadd.f32 %v2430_v26, %v2429_v12 }
 0x2b7   : > { %v2438_v23 = vadd.f32 %v2437_v9, %v2436_v28 }
 0x2b8   : > { %v2439_v38 = vadd.f32 %v2431_v52, %v2417_v47  ;;  %v3460_v47 = vld [vmem:[#allocation10 + $0x58] sm:$0xff]  }
 0x2b9   : > { %v2440_v22 = vadd.f32 %v2438_v23, %v2424_v18  ;;  %v3461_v52 = vld [vmem:[#allocation10 + $0xd8] sm:$0xff]   ;;  %3170 = vmatprep.subr.bf16.mxu0 %v3460_v47 }
 0x2ba   : > { %v3462_v18 = vld [vmem:[#allocation10 + $0x18] sm:$0xff]   ;;  %3192 = vmatprep.subr.bf16.mxu1 %v3461_v52 }
 0x2bb   : > { %v2441_v8 = vadd.f32 %v2440_v22, %v2439_v38  ;;  %v3463_v23 = vld [vmem:[#allocation10 + $0x98] sm:$0xff]   ;;  %3171 = vmatpush3.bf16.msra.mxu0 %v3462_v18  ;;  %v3464_v38 = vld [vmem:[#allocation10 + $0x50] sm:$0xff]  }
 0x2bc   : > { %3193 = vmatpush3.bf16.msra.mxu1 %v3463_v23  ;;  %v3465_v22 = vld [vmem:[#allocation10 + $0xd0] sm:$0xff]   ;;  %3172 = vmatprep.subr.bf16.mxu0 %v3464_v38 }
 0x2bd   : > { %2443 = vrot.lane.b32.xlu0 %v2441_v8, %s3746_s16  ;;  %3194 = vmatprep.subr.bf16.mxu1 %v3465_v22 }
 0x32f   : > { %v2444_v6 = vpop.permute.xlu0 %2443 }
 0x330   : > { %v2446_v16 = vadd.f32 %v2444_v6, %v2441_v8  ;;  %v3466_v8 = vld [vmem:[#allocation10 + $0x10] sm:$0xff]  }
 0x331   : > { %v3467_v6 = vld [vmem:[#allocation10 + $0x90] sm:$0xff]   ;;  %3173 = vmatpush3.bf16.msra.mxu0 %v3466_v8 }
 0x332   : > { %2448 = vrot.lane.b32.xlu1 %v2446_v16, %s3744_s25  ;;  %3195 = vmatpush3.bf16.msra.mxu1 %v3467_v6 }
 0x3a4   : > { %v2449_v29 = vpop.permute.xlu1 %2448 }
 0x3a5   : > { %v2451_v58 = vadd.f32 %v2449_v29, %v2446_v16  ;;  %v3468_v16 = vld [vmem:[#allocation10 + $0x48] sm:$0xff]  }
 0x3a6   : > { %v3469_v29 = vld [vmem:[#allocation10 + $0xc8] sm:$0xff]   ;;  %3174 = vmatprep.subr.bf16.mxu0 %v3468_v16 }
 0x3a7   : > { %v2452_v17 = vmul.f32 0.00390625, %v2451_v58  ;;  %v3470_v58 = vld [vmem:[#allocation10 + $0x8] sm:$0xff]   ;;  %3196 = vmatprep.subr.bf16.mxu1 %v3469_v29 }
 0x3a8   : > { %3175 = vmatpush3.bf16.msra.mxu0 %v3470_v58 }
 0x3a9   : > { %v2457_v14 = vrot.slane %v2452_v17, %v4863_v40  ;;  %v3471_v17 = vld [vmem:[#allocation10 + $0x88] sm:$0xff]  }
 0x3aa   : > { %3197 = vmatpush3.bf16.msra.mxu1 %v3471_v17 }
 0x3ab   : > { %v2458_v62 = vmul.f32 %v2457_v14, %v2453_v36  ;;  %v3472_v36 = vld [vmem:[#allocation10 + $0x40] sm:$0xff]  }
 0x3ac   : > { %v3473_v14 = vld [vmem:[#allocation10 + $0xc0] sm:$0xff]   ;;  %3176 = vmatprep.subr.bf16.mxu0 %v3472_v36 }
 0x3ad   : > { %v2460_v0 = vsel %vm2459_vm10, %v2458_v62, 0.0  ;;  %3198 = vmatprep.subr.bf16.mxu1 %v3473_v14 }
 0x3ae   : > { %2461 = vadd.xlane.f32.xlu0 %v2460_v0  ;;  %v3474_v0 = vld [vmem:[#allocation10] sm:$0xff]  }
 0x3af   : > { %3177 = vmatpush3.bf16.msra.mxu0 %v3474_v0 }
 0x437   : > { %v2462_v43 = vpop.xlane.xlu0 %2461 }
 0x438   : > { %v2464_v53 = vadd.f32 %v2463_v49, %v2462_v43  ;;  %v3475_v49 = vld [vmem:[#allocation10 + $0x80] sm:$0xff]  }
 0x439   : > { %3199 = vmatpush3.bf16.msra.mxu1 %v3475_v49 }
 0x43a   : > { %v3120_v25 = vmul.f32 -1.442695, %v2464_v53 }
 0x43c   : > { %3540 = vpow2.f32 %v3120_v25 }
 0x449   : > { %v3541_v3 = vpop.eup %3540 }
 0x44a   : > { %v2468_v4 = vadd.f32 1.0, %v3541_v3 }
 0x44c   : > { %3542 = vrcp.f32 %v2468_v4 }
 0x459   : > { %v3543_v13 = vpop.eup %3542 }
 0x45a   : > { %v2471_v34 = vmul.f32 %v3543_v13, %v2464_v53 }
 0x45c   : > { %2475 = vperm.xlu1 %3298, %v2471_v34  }
 0x4d7   : > { %v2476_v46 = vpop.permute.xlu1 %2475 }
 0x4d8   : > { %v2478_v63 = vmul.f32 %v2476_v46, %v2472_v27  ;;  %v3548_v46 = vld [vmem:[#allocation2 + $0x1] sm:$0xff] }
 0x4da   : > { %v2479_v50 = vsel %vm2459_vm10, %v2478_v63, 0.0 }
 0x4db   : > { %v2480_v7 = vrot.slane %v2479_v50, 4 }
 0x4dd   : > { %v2481_v51 = vadd.f32 %v2480_v7, %v2479_v50 }
 0x4df   : > { %v2482_v32 = vrot.slane %v2481_v51, 2 }
 0x4e1   : > { %v2483_v10 = vadd.f32 %v2482_v32, %v2481_v51  ;;  %v3549_v32 = vld [vmem:[#allocation2 + $0x9] sm:$0xff] }
 0x4e3   : > { %v2484_v44 = vrot.slane %v2483_v10, 1 }
 0x4e5   : > { %v2485_v12 = vadd.f32 %v2484_v44, %v2483_v10 }
 0x4e7   : > { %v2487_v30 = vadd.f32 %v2486_v33, %v2485_v12 }
 0x4e9   : > { %v3121_v28 = vmul.f32 -1.442695, %v2487_v30 }
 0x4eb   : > { %3544 = vpow2.f32 %v3121_v28 }
 0x4f8   : > { %v3545_v26 = vpop.eup %3544 }
 0x4f9   : > { %v2491_v9 = vadd.f32 1.0, %v3545_v26 }
 0x4fb   : > { %3546 = vrcp.f32 %v2491_v9 }
 0x508   : > { %v3547_v62 = vpop.eup %3546 }
 0x509   : > { %2495 = vrot.lane.b32.xlu1 %v3547_v62, %s3745_s30 }
 0x50d   : > { %2498 = vrot.lane.b32.xlu1 %v3547_v62, %s3746_s16  ;;  %s3161_s16 = sshll.u32 %s3831_s21, 8  ;;  %s3747_s21 = smov [#allocation12]  }
 0x50e   : > { %s4695_s3 = scalar_lea.hbm %s4749_s11, %s3161_s16  ;;  %s3660_s13 = sshll.u32 %s3747_s21, 4  ;;  %s3661_s13 = int_to_ptr.vmem [resolvable:$false] %s3660_s13 }
 0x50f   : > { %s3662_s24 = scalar_lea.vmem %s3661_s13, 512  ;;  %p3663_p1 = scmp.lt.s32.totalorder %s4690_s29, %s3661_s13 }
 0x510   : > { %p3664_p3 = scmp.lt.s32.totalorder %s3662_s24, %s3656_s15 }
 0x511   : > { %2501 = vrot.lane.b32.xlu1 %v3547_v62, %s3744_s25 }
 0x512   : > { %p3665_p6 = por %p3664_p3, %p3663_p1 }
 0x514   : > { %p3666_p9 = pnand %p3665_p6, %p3659_p10 }
 0x57b   : > { %v2496_v43 = vpop.permute.xlu1 %2495 }
 0x57c   : > { %v2504_v25 = vsel %vm1419_vm4, %v3547_v62, %v2496_v43 }
 0x57f   : > { %v2499_v53 = vpop.permute.xlu1 %2498 }
 0x580   : > { %v2506_v3 = vsel %vm2505_vm11, %v2504_v25, %v2499_v53 }
 0x583   : > { %v2502_v4 = vpop.permute.xlu1 %2501 }
 0x584   : > { %v2507_v13 = vsel %vm1446_vm5, %v2506_v3, %v2502_v4 }
 0x585   : > { %v2511_v34 = vrot.slane %v2507_v13, %v4863_v40 }
 0x587   : > { %v2513_v5 = vmul.f32 %v2511_v34, %v4633_v2  ;;  %v2517_v1 = vmul.f32 %v2511_v34, %v4635_v59  ;;  %v2515_v60 = vmul.f32 %v2511_v34, %v4643_v15  ;;  %v2519_v45 = vmul.f32 %v2511_v34, %v4645_v20 }
 0x588   : > { %v2512_v35 = vmul.f32 %v2511_v34, %v4629_v48  ;;  %v2516_v11 = vmul.f32 %v2511_v34, %v4631_v19  ;;  %v2514_v54 = vmul.f32 %v2511_v34, %v4637_v57  ;;  %v2518_v61 = vmul.f32 %v2511_v34, %v4639_v42  ;;  %v3122_v48 = vld [vmem:[%s4748_s10] ss:$0 sm:$0xff] }
 0x589   : > { %v2521_v56 = vpack.c.bf16 %v2517_v1, %v2513_v5  ;;  %v2523_v55 = vpack.c.bf16 %v2519_v45, %v2515_v60 }
 0x58a   : > { %v2520_v24 = vpack.c.bf16 %v2516_v11, %v2512_v35  ;;  %v2522_v40 = vpack.c.bf16 %v2518_v61, %v2514_v54 }
 0x58b   : > { %2819 = vmatprep.mubr.bf16.mxu0 %v2521_v56  ;;  %2860 = vmatprep.mubr.bf16.mxu1 %v2523_v55 }
 0x58c   : > { %2820 = vmatmul.mubr.bf16.vlgmr.msra.gmra.mxu0 %v2520_v24  ;;  %2861 = vmatmul.mubr.bf16.vlgmr.msra.gmra.mxu1 %v2522_v40 }
 0x64c   : > { %v3178_v2 = vpop.f32.mrf.mxu0  ;;  %v3200_v59 = vpop.f32.mrf.mxu1 }
 0x64e   : > { %v3179_v19 = vpop.f32.mrf.mxu0  ;;  %v3201_v15 = vpop.f32.mrf.mxu1 }
 0x64f   : > { %v3180_v57 = vadd.f32 %v3179_v19, %v3178_v2  ;;  %v3202_v39 = vadd.f32 %v3201_v15, %v3200_v59 }
 0x650   : > { %v3181_v42 = vpop.f32.mrf.mxu0  ;;  %v3203_v20 = vpop.f32.mrf.mxu1 }
 0x651   : > { %v2822_v21 = vadd.f32 %v3180_v57, %v3122_v48 }
 0x652   : > { %v3182_v41 = vpop.f32.mrf.mxu0  ;;  %v3204_v37 = vpop.f32.mrf.mxu1 }
 0x653   : > { %v2863_v31 = vadd.f32 %v3202_v39, %v2822_v21  ;;  %v3183_v27 = vadd.f32 %v3182_v41, %v3181_v42  ;;  %v3205_v7 = vadd.f32 %v3204_v37, %v3203_v20 }
 0x655   : > { %v2869_v63 = vadd.f32 %v3548_v46, %v2863_v31  ;;  %v2825_v50 = vadd.f32 %v3183_v27, %v3122_v48 }
 0x657   : > { %2871 = vst [vmem:[%s448_s26] sm:$0xff] %v2869_v63  ;;  %v2866_v51 = vadd.f32 %v3205_v7, %v2825_v50 }
 0x659   : > { %v2870_v10 = vadd.f32 %v3549_v32, %v2866_v51 }
 0x65b   : > { %2872 = vst [vmem:[%s448_s26 + $0x8] sm:$0xff] %v2870_v10 }
 0x65c   : > { %3669 = shalt.err (!%p3666_p9)
}
 0x65d   : > { %s3670_s1 = scalar_lea.hbm %s4695_s3, 256  ;;  %s3674_s30 = scalar_lea.hbm %s4749_s11, 512 }
 0x65e   : > { %p3671_p7 = scmp.ne.s32.totalorder %s4695_s3, %s3670_s1  ;;  %p3675_p2 = scmp.lt.s32.totalorder %s4695_s3, %s4749_s11 }
 0x65f   : > { %p3676_p11 = scmp.lt.s32.totalorder %s3674_s30, %s3670_s1 }
 0x660   : > { %p3672_p4 = pnand %p3671_p7, %p4864_p0 }
 0x661   : > { %p3677_p13 = por %p3676_p11, %p3675_p2 }
 0x662   : > { %p3673_p8 = pneg %p3672_p4 }
 0x664   : > { %p3678_p12 = pnand %p3677_p13, %p3673_p8 }
 0x666   : > { %3681 = shalt.err (!%p3678_p12)
}
 0x667   : > { %s3748_s28 = smov 128   ;;  %s3749_s14 = smov 8  }
 0x668   : > { %3220 = dma.vmem_to_hbm [thread:$0]  (%p4864_p0), %s4690_s29, 256, %s4695_s3, %s2874_s12, %s3748_s28, %s3748_s28, %s3749_s14  }
 0x669 PF: > { %s4865_s15 = sld [smem:[#allocation17_spill]]  ;;  %s2902_s21 = sand.u32 1, %s3716_s17  }
 0x66a   : > { %p4867_p10 = scmp.ge.s32.totalorder %s3728_s20, 2  ;;  %s2903_s13 = scalar_lea.sflag [#allocation6], %s2902_s21 }
 0x66f   : > { %p4866_p5 = scmp.ne.s32.totalorder %s4865_s15, 0 }
 0x671   : > { %p3237_p1 = pnand %p4867_p10, %p4866_p5 }
 0x673   : > { %p3238_p3 = pneg %p3237_p1 }
 0x675   : > { %3711 = dma.done.wait (%p3238_p3), %s2903_s13, 256  }
 0x676   : > { %3713 = vsyncadd (%p3238_p3), %s2903_s13, 4294967040  ;;  %s4868_s24 = sld [smem:[#allocation18_spill]]  ;;  %p26_p6 = scmp.ge.s32.totalorder %s3890_s22, 4  }
 0x677   : > { %s4869_s17 = smov %s3720_s18  ;;  %s4870_s18 = smov %s3724_s19 }
 0x678   : > { %s4872_s20 = smov %s3890_s22  ;;  %28 = sbr.rel (!%p26_p6) target bundleno = 11 (0xb), region = 128 }
 0x67c   : > { %s4871_s19 = smov %s4868_s24 }
 0x67d   :  { %2908 = vsyncpa [#allocation5], 1 }
 0x67e   :  { %2910 = vsyncpa [#allocation5 + $0x1], 1 }
 0x67f   :  { %2911 = vsyncpa [#allocation8], 1 }
 0x680   :  { %2912 = vsyncpa [#allocation11], 1 }
 0x681   :  { %2913 = vsyncpa [#allocation6], 1 }
 0x682   :  { %2915 = vsyncpa [#allocation6 + $0x1], 1 }

</bundles_post_ra>
